<compile_context>
chip_gen: v7x
topology: tpu7x:2x2x1
jax: 0.10.0
libtpu: 0.0.40
codegen_flags: <defaults>
</compile_context>

<pallas_src>
import jax
import jax.numpy as jnp
from jax import lax
from jax.experimental import pallas as pl
from jax.experimental.pallas import tpu as pltpu

N_PAD = 128        # lane-dense width used for conv channels / classes


def _round_up(v, m):
    return -(-v // m) * m


def _choose_tile_b(batch):
    # Large tiles amortize the ~0.35 us per-grid-step overhead and give the MXU a big M,
    # while keeping >= 4 grid steps at production batch sizes so the "parallel" axis can
    # shard across both v7x TensorCores and pipeline HBM<->VMEM.
    t = -(-batch // 4)              # ceil(batch / 4)
    t = _round_up(max(t, 8), 8)     # sublane granule
    return min(512, t)


def _make_kernel(tile_b, l_pad, w, k_pad, n_pad):
    def kernel(tok_ref, g_ref, w_ref, vec_ref, out_ref):
        tok = tok_ref[...]                        # (tile_b, l_pad*w) int32 window indices
        g = g_ref[...]                            # (k_pad, 128) fused gather+conv table
        hw_w = w_ref[0]                           # (128, 128) highway
        lin_w = w_ref[1]                          # (128, 128) final linear
        vec = vec_ref[...]                        # (8 + l_pad, 128) biases / masks
        conv_b = vec[0:1, :]
        hw_b = vec[1:2, :]
        lin_b = vec[2:3, :]
        cls_mask = vec[3:4, :]                    # 1.0 for real classes, 0.0 for pad lanes

        # lane iota over the fused contraction dim, hoisted out of the time loop
        kiota = lax.broadcasted_iota(jnp.int32, (tile_b, k_pad), 1)

        # ---- embedding lookup + concat + all convolutions, streamed over time with a
        # ---- running max (no (tile_b, L, 128) intermediate ever materialized) ----
        pooled = jnp.zeros((tile_b, n_pad), jnp.float32)
        for t in range(l_pad):                    # static unroll; l_pad is small (text CNN)
            # multi-hot row (w hots) selecting the fused embedding*conv rows for this
            # time position's window; hot positions are disjoint so OR == sum.
            hot = kiota == tok[:, t * w: t * w + 1]
            for j in range(1, w):
                hot = hot | (kiota == tok[:, t * w + j: t * w + j + 1])
            oh = hot.astype(jnp.float32)          # (tile_b, k_pad)

            # one MXU matmul == embedding gather + concat + every conv at this position
            conv_t = jnp.dot(oh, g, preferred_element_type=jnp.float32)   # (tile_b, 128)
            # +bias, ReLU, then multiply by the precomputed per-(t, channel) validity
            # mask (zeroing invalid positions is max-pool-safe since ReLU >= 0).
            conv_t = jnp.maximum(conv_t + conv_b, 0.0) * vec[8 + t: 9 + t, :]
            pooled = jnp.maximum(pooled, conv_t)

        # ---- highway layer ----
        hw = jnp.dot(pooled, hw_w, preferred_element_type=jnp.float32) + hw_b
        sig = jax.nn.sigmoid(hw)
        pred = sig * jnp.maximum(hw, 0.0) + (1.0 - sig) * pooled

        # TODO(synk): nn.Dropout omitted (eval-mode identity).

        # ---- final linear + log-softmax over the real classes ----
        logits = jnp.dot(pred, lin_w, preferred_element_type=jnp.float32) + lin_b
        logits = jnp.where(cls_mask > 0.5, logits, jnp.float32(-1e30))
        m = jnp.max(logits, axis=1, keepdims=True)
        lse = m + jnp.log(jnp.sum(jnp.exp(logits - m), axis=1, keepdims=True))
        out_ref[...] = logits - lse               # lane-dense (tile_b, 128) store

    return kernel


def _pack_constants(params, filter_sizes, num_filters, num_classes, seq_len, l_pad):
    """Fused gather+conv table G, highway/linear stack, and the bias/mask table."""
    emb = params["emb"].astype(jnp.float32)           # (V, E)
    da = params["da_emb"].astype(jnp.float32)         # (D, E)
    V, E = emb.shape
    D = da.shape[0]
    emb2 = 2 * E
    f_max = max(filter_sizes)
    n_total = sum(num_filters)
    vd = V + D
    k = f_max * vd
    k_pad = _round_up(k, 8)
    assert n_total <= N_PAD and num_classes <= N_PAD and seq_len >= f_max
    # TODO(synk): the fused table grows as f_max * vocab; for large vocabularies switch
    # to an in-kernel table gather instead of the fused G matmul.
    assert k <= 4096, "fused gather-conv table assumes a small vocabulary"

    # packed conv weights: rows [0, f*2E) filled per filter's channel block, rest zero
    wc = jnp.zeros((f_max * emb2, N_PAD), jnp.float32)
    conv_b = jnp.zeros((N_PAD,), jnp.float32)
    col = 0
    for ci, (f, n) in enumerate(zip(filter_sizes, num_filters)):
        wmat = params["conv_w"][ci].reshape(f * emb2, n).astype(jnp.float32)
        wc = wc.at[: f * emb2, col:col + n].set(wmat)
        conv_b = conv_b.at[col:col + n].set(params["conv_b"][ci][0].astype(jnp.float32))
        col += n

    # G[i*vd + v]      = emb[v]      @ wc[i-th emb half]
    # G[i*vd + V + d]  = da_emb[d]   @ wc[i-th da  half]
    g = jnp.zeros((k_pad, N_PAD), jnp.float32)
    for i in range(f_max):
        g = g.at[i * vd: i * vd + V, :].set(emb @ wc[i * emb2: i * emb2 + E, :])
        g = g.at[i * vd + V: i * vd + vd, :].set(da @ wc[i * emb2 + E: (i + 1) * emb2, :])

    w_stack = jnp.zeros((2, N_PAD, N_PAD), jnp.float32)
    w_stack = w_stack.at[0, :n_total, :n_total].set(params["hw_w"].astype(jnp.float32))
    w_stack = w_stack.at[1, :n_total, :num_classes].set(params["lin_w"].astype(jnp.float32))

    vec = jnp.zeros((8 + l_pad, N_PAD), jnp.float32)
    vec = vec.at[0, :].set(conv_b)
    vec = vec.at[1, :n_total].set(params["hw_b"][0].astype(jnp.float32))
    vec = vec.at[2, :num_classes].set(params["lin_b"][0].astype(jnp.float32))
    vec = vec.at[3, :num_classes].set(1.0)
    col = 0
    for f, n in zip(filter_sizes, num_filters):        # per-(t, channel) validity mask
        vec = vec.at[8: 8 + (seq_len - f + 1), col:col + n].set(1.0)
        col += n
    return g, w_stack, vec, k_pad, vd, V


def _build_token_windows(x, temp, b_pad, l_pad, f_max, vd, v_off):
    """(b_pad, l_pad*2*f_max) int32: fused one-hot indices for every (b, t, window-pos)."""
    B, L = x.shape
    l_ext = l_pad + f_max - 1
    xp = jnp.zeros((b_pad, l_ext), jnp.int32).at[:B, :L].set(x.astype(jnp.int32))
    tp = jnp.zeros((b_pad, l_ext), jnp.int32).at[:B, :L].set(temp.astype(jnp.int32))
    cols = []
    for i in range(f_max):
        cols.append(i * vd + xp[:, i:i + l_pad])          # word-emb hot index
        cols.append(i * vd + v_off + tp[:, i:i + l_pad])  # da-emb hot index
    idx = jnp.stack(cols, axis=-1)                        # (b_pad, l_pad, 2*f_max)
    return idx.reshape(b_pad, l_pad * 2 * f_max)


def discriminator_forward(x, temp, params, *, filter_sizes, num_filters, num_classes):
    B, L = x.shape
    f_max = max(filter_sizes)
    w = 2 * f_max
    l_pad = _round_up(L, 8)
    tile_b = _choose_tile_b(B)
    n_tiles = -(-B // tile_b)
    b_pad = n_tiles * tile_b

    g, w_stack, vec, k_pad, vd, v_off = _pack_constants(
        params, filter_sizes, num_filters, num_classes, L, l_pad)
    tok = _build_token_windows(x, temp, b_pad, l_pad, f_max, vd, v_off)

    kernel = _make_kernel(tile_b, l_pad, w, k_pad, N_PAD)
    out = pl.pallas_call(
        kernel,
        out_shape=jax.ShapeDtypeStruct((b_pad, N_PAD), jnp.float32),
        grid_spec=pltpu.PrefetchScalarGridSpec(
            num_scalar_prefetch=0,
            grid=(n_tiles,),
            in_specs=[
                pl.BlockSpec((tile_b, l_pad * w), lambda i: (i, 0)),   # streamed tokens
                pl.BlockSpec((k_pad, N_PAD), lambda i: (0, 0)),        # fused G (resident)
                pl.BlockSpec((2, N_PAD, N_PAD), lambda i: (0, 0, 0)),  # hw/lin weights
                pl.BlockSpec((8 + l_pad, N_PAD), lambda i: (0, 0)),    # biases / masks
            ],
            out_specs=pl.BlockSpec((tile_b, N_PAD), lambda i: (i, 0)),
        ),
        compiler_params=pltpu.CompilerParams(dimension_semantics=("parallel",)),
    )(tok, g, w_stack, vec)

    return out[:B, :num_classes]


def reference_forward(x, temp, params, filter_sizes, num_filters):
    """Pure-JAX reference of the PyTorch forward (eval mode)."""
    emb_c = jnp.concatenate([params["emb"][x], params["da_emb"][temp]], axis=-1)
    B, L, _ = emb_c.shape
    pools = []
    for ci, f in enumerate(filter_sizes):
        wmat = params["conv_w"][ci]                 # (f, 2E, n)
        b = params["conv_b"][ci]                    # (1, n)
        l_out = L - f + 1
        acc = jnp.zeros((B, l_out, num_filters[ci]), jnp.float32)
        for i in range(f):
            acc = acc + jnp.einsum("blc,cn->bln", emb_c[:, i:i + l_out, :], wmat[i])
        acc = jax.nn.relu(acc + b[None, :, :])
        pools.append(jnp.max(acc, axis=1))
    pred = jnp.concatenate(pools, axis=1)
    hw = pred @ params["hw_w"] + params["hw_b"]
    sig = jax.nn.sigmoid(hw)
    pred = sig * jax.nn.relu(hw) + (1.0 - sig) * pred
    logits = pred @ params["lin_w"] + params["lin_b"]
    return jax.nn.log_softmax(logits, axis=1)


if __name__ == "__main__":
    # Module hyper-parameters (small, consistent with the forward pass).
    num_classes = 4
    const_classes = 3
    vocab_size = 32
    emb_dim = 16
    filter_sizes = [2, 3]
    num_filters = [8, 8]
    padding_idx = 0
    batch, seq_len = 2, 8
    total_filters = sum(num_filters)

    key = jax.random.PRNGKey(0)
    keys = jax.random.split(key, 12)

    def uni(k, shape):
        # Matches init_parameters(): every parameter ~ U(-0.05, 0.05).
        return jax.random.uniform(k, shape, jnp.float32, -0.05, 0.05)

    params = {
        "emb": uni(keys[0], (vocab_size, emb_dim)),
        "da_emb": uni(keys[1], (const_classes + 1, emb_dim)),
        "conv_w": [uni(keys[2 + i], (f, emb_dim * 2, n))
                   for i, (n, f) in enumerate(zip(num_filters, filter_sizes))],
        "conv_b": [uni(keys[4 + i], (1, n)) for i, n in enumerate(num_filters)],
        "hw_w": uni(keys[6], (total_filters, total_filters)),
        "hw_b": uni(keys[7], (1, total_filters)),
        "lin_w": uni(keys[8], (total_filters, num_classes)),
        "lin_b": uni(keys[9], (1, num_classes)),
    }

    x = jax.random.randint(keys[10], (batch, seq_len), 0, vocab_size, dtype=jnp.int32)
    temp = jax.random.randint(keys[11], (batch, seq_len), 0, const_classes + 1,
                              dtype=jnp.int32)

    out = discriminator_forward(x, temp, params,
                                filter_sizes=filter_sizes,
                                num_filters=num_filters,
                                num_classes=num_classes)
    out = jax.block_until_ready(out)

    ref = reference_forward(x, temp, params, filter_sizes, num_filters)
    assert out.shape == (batch, num_classes)
    assert jnp.allclose(out, ref, atol=1e-4), (out, ref)
    print("KERNEL_OK")
</pallas_src>

<mosaic_0001>
module attributes {stable_mosaic.version = 11 : i64} {
  func.func @kernel(%arg0: i32, %arg1: memref<8x48xi32, #tpu.memory_space<vmem>>, %arg2: memref<112x128xf32, #tpu.memory_space<vmem>>, %arg3: memref<2x128x128xf32, #tpu.memory_space<vmem>>, %arg4: memref<16x128xf32, #tpu.memory_space<vmem>>, %arg5: memref<8x128xf32, #tpu.memory_space<vmem>>) attributes {dimension_semantics = [#tpu.dimension_semantics<parallel>], iteration_bounds = array<i64: 1>, scalar_prefetch = 0 : i64, scratch_operands = 0 : i64, tpu.core_type = #tpu.core_type<tc>, window_params = [{transform_indices = @transform_0, window_bounds = array<i64: 8, 48>}, {pipeline_mode = #tpu.pipeline_mode<synchronous>, transform_indices = @transform_1, window_bounds = array<i64: 112, 128>}, {pipeline_mode = #tpu.pipeline_mode<synchronous>, transform_indices = @transform_2, window_bounds = array<i64: 2, 128, 128>}, {pipeline_mode = #tpu.pipeline_mode<synchronous>, transform_indices = @transform_3, window_bounds = array<i64: 16, 128>}, {transform_indices = @transform_4, window_bounds = array<i64: 8, 128>}]} {
    %c0 = arith.constant 0 : index
    %c0_0 = arith.constant 0 : index
    %0 = vector.load %arg1[%c0, %c0_0] : memref<8x48xi32, #tpu.memory_space<vmem>>, vector<8x48xi32>
    %c0_1 = arith.constant 0 : index
    %c0_2 = arith.constant 0 : index
    %1 = vector.load %arg2[%c0_1, %c0_2] : memref<112x128xf32, #tpu.memory_space<vmem>>, vector<112x128xf32>
    %c0_3 = arith.constant 0 : index
    %c0_4 = arith.constant 0 : index
    %c0_5 = arith.constant 0 : index
    %2 = vector.load %arg3[%c0_3, %c0_4, %c0_5] : memref<2x128x128xf32, #tpu.memory_space<vmem>>, vector<1x128x128xf32>
    %3 = vector.shape_cast %2 : vector<1x128x128xf32> to vector<128x128xf32>
    %c1 = arith.constant 1 : index
    %c0_6 = arith.constant 0 : index
    %c0_7 = arith.constant 0 : index
    %4 = vector.load %arg3[%c1, %c0_6, %c0_7] : memref<2x128x128xf32, #tpu.memory_space<vmem>>, vector<1x128x128xf32>
    %5 = vector.shape_cast %4 : vector<1x128x128xf32> to vector<128x128xf32>
    %c0_8 = arith.constant 0 : index
    %c0_9 = arith.constant 0 : index
    %6 = vector.load %arg4[%c0_8, %c0_9] : memref<16x128xf32, #tpu.memory_space<vmem>>, vector<16x128xf32>
    %7 = vector.extract_strided_slice %6 {offsets = [0, 0], sizes = [1, 128], strides = [1, 1]} : vector<16x128xf32> to vector<1x128xf32>
    %8 = vector.extract_strided_slice %6 {offsets = [1, 0], sizes = [1, 128], strides = [1, 1]} : vector<16x128xf32> to vector<1x128xf32>
    %9 = vector.extract_strided_slice %6 {offsets = [2, 0], sizes = [1, 128], strides = [1, 1]} : vector<16x128xf32> to vector<1x128xf32>
    %10 = vector.extract_strided_slice %6 {offsets = [3, 0], sizes = [1, 128], strides = [1, 1]} : vector<16x128xf32> to vector<1x128xf32>
    %11 = tpu.iota {dimensions = array<i32: 1>} : vector<8x112xi32>
    %cst = arith.constant 0.000000e+00 : f32
    %12 = vector.broadcast %cst : f32 to vector<8x128xf32>
    %13 = vector.extract_strided_slice %0 {offsets = [0, 0], sizes = [8, 1], strides = [1, 1]} : vector<8x48xi32> to vector<8x1xi32>
    %14 = vector.broadcast %13 : vector<8x1xi32> to vector<8x112xi32>
    %15 = arith.cmpi eq, %11, %14 : vector<8x112xi32>
    %16 = vector.extract_strided_slice %0 {offsets = [0, 1], sizes = [8, 1], strides = [1, 1]} : vector<8x48xi32> to vector<8x1xi32>
    %17 = vector.broadcast %16 : vector<8x1xi32> to vector<8x112xi32>
    %18 = arith.cmpi eq, %11, %17 : vector<8x112xi32>
    %19 = arith.ori %15, %18 : vector<8x112xi1>
    %20 = vector.extract_strided_slice %0 {offsets = [0, 2], sizes = [8, 1], strides = [1, 1]} : vector<8x48xi32> to vector<8x1xi32>
    %21 = vector.broadcast %20 : vector<8x1xi32> to vector<8x112xi32>
    %22 = arith.cmpi eq, %11, %21 : vector<8x112xi32>
    %23 = arith.ori %19, %22 : vector<8x112xi1>
    %24 = vector.extract_strided_slice %0 {offsets = [0, 3], sizes = [8, 1], strides = [1, 1]} : vector<8x48xi32> to vector<8x1xi32>
    %25 = vector.broadcast %24 : vector<8x1xi32> to vector<8x112xi32>
    %26 = arith.cmpi eq, %11, %25 : vector<8x112xi32>
    %27 = arith.ori %23, %26 : vector<8x112xi1>
    %28 = vector.extract_strided_slice %0 {offsets = [0, 4], sizes = [8, 1], strides = [1, 1]} : vector<8x48xi32> to vector<8x1xi32>
    %29 = vector.broadcast %28 : vector<8x1xi32> to vector<8x112xi32>
    %30 = arith.cmpi eq, %11, %29 : vector<8x112xi32>
    %31 = arith.ori %27, %30 : vector<8x112xi1>
    %32 = vector.extract_strided_slice %0 {offsets = [0, 5], sizes = [8, 1], strides = [1, 1]} : vector<8x48xi32> to vector<8x1xi32>
    %33 = vector.broadcast %32 : vector<8x1xi32> to vector<8x112xi32>
    %34 = arith.cmpi eq, %11, %33 : vector<8x112xi32>
    %35 = arith.ori %31, %34 : vector<8x112xi1>
    %36 = arith.extui %35 : vector<8x112xi1> to vector<8x112xi32>
    %37 = arith.sitofp %36 : vector<8x112xi32> to vector<8x112xf32>
    %cst_10 = arith.constant dense<0.000000e+00> : vector<8x128xf32>
    %38 = tpu.matmul %37, %1, %cst_10 {dimension_numbers = #tpu.dot_dimension_numbers<[1], [0], [0], [1], [0, 0, 1, 1], [], []>} : vector<8x112xf32>, vector<112x128xf32>, vector<8x128xf32> -> vector<8x128xf32>
    %39 = vector.broadcast %7 : vector<1x128xf32> to vector<8x128xf32>
    %40 = arith.addf %38, %39 : vector<8x128xf32>
    %cst_11 = arith.constant 0.000000e+00 : f32
    %41 = vector.broadcast %cst_11 : f32 to vector<8x128xf32>
    %42 = arith.maximumf %40, %41 : vector<8x128xf32>
    %43 = vector.extract_strided_slice %6 {offsets = [8, 0], sizes = [1, 128], strides = [1, 1]} : vector<16x128xf32> to vector<1x128xf32>
    %44 = vector.broadcast %43 : vector<1x128xf32> to vector<8x128xf32>
    %45 = arith.mulf %42, %44 : vector<8x128xf32>
    %46 = arith.maximumf %12, %45 : vector<8x128xf32>
    %47 = vector.extract_strided_slice %0 {offsets = [0, 6], sizes = [8, 1], strides = [1, 1]} : vector<8x48xi32> to vector<8x1xi32>
    %48 = vector.broadcast %47 : vector<8x1xi32> to vector<8x112xi32>
    %49 = arith.cmpi eq, %11, %48 : vector<8x112xi32>
    %50 = vector.extract_strided_slice %0 {offsets = [0, 7], sizes = [8, 1], strides = [1, 1]} : vector<8x48xi32> to vector<8x1xi32>
    %51 = vector.broadcast %50 : vector<8x1xi32> to vector<8x112xi32>
    %52 = arith.cmpi eq, %11, %51 : vector<8x112xi32>
    %53 = arith.ori %49, %52 : vector<8x112xi1>
    %54 = vector.extract_strided_slice %0 {offsets = [0, 8], sizes = [8, 1], strides = [1, 1]} : vector<8x48xi32> to vector<8x1xi32>
    %55 = vector.broadcast %54 : vector<8x1xi32> to vector<8x112xi32>
    %56 = arith.cmpi eq, %11, %55 : vector<8x112xi32>
    %57 = arith.ori %53, %56 : vector<8x112xi1>
    %58 = vector.extract_strided_slice %0 {offsets = [0, 9], sizes = [8, 1], strides = [1, 1]} : vector<8x48xi32> to vector<8x1xi32>
    %59 = vector.broadcast %58 : vector<8x1xi32> to vector<8x112xi32>
    %60 = arith.cmpi eq, %11, %59 : vector<8x112xi32>
    %61 = arith.ori %57, %60 : vector<8x112xi1>
    %62 = vector.extract_strided_slice %0 {offsets = [0, 10], sizes = [8, 1], strides = [1, 1]} : vector<8x48xi32> to vector<8x1xi32>
    %63 = vector.broadcast %62 : vector<8x1xi32> to vector<8x112xi32>
    %64 = arith.cmpi eq, %11, %63 : vector<8x112xi32>
    %65 = arith.ori %61, %64 : vector<8x112xi1>
    %66 = vector.extract_strided_slice %0 {offsets = [0, 11], sizes = [8, 1], strides = [1, 1]} : vector<8x48xi32> to vector<8x1xi32>
    %67 = vector.broadcast %66 : vector<8x1xi32> to vector<8x112xi32>
    %68 = arith.cmpi eq, %11, %67 : vector<8x112xi32>
    %69 = arith.ori %65, %68 : vector<8x112xi1>
    %70 = arith.extui %69 : vector<8x112xi1> to vector<8x112xi32>
    %71 = arith.sitofp %70 : vector<8x112xi32> to vector<8x112xf32>
    %cst_12 = arith.constant dense<0.000000e+00> : vector<8x128xf32>
    %72 = tpu.matmul %71, %1, %cst_12 {dimension_numbers = #tpu.dot_dimension_numbers<[1], [0], [0], [1], [0, 0, 1, 1], [], []>} : vector<8x112xf32>, vector<112x128xf32>, vector<8x128xf32> -> vector<8x128xf32>
    %73 = vector.broadcast %7 : vector<1x128xf32> to vector<8x128xf32>
    %74 = arith.addf %72, %73 : vector<8x128xf32>
    %cst_13 = arith.constant 0.000000e+00 : f32
    %75 = vector.broadcast %cst_13 : f32 to vector<8x128xf32>
    %76 = arith.maximumf %74, %75 : vector<8x128xf32>
    %77 = vector.extract_strided_slice %6 {offsets = [9, 0], sizes = [1, 128], strides = [1, 1]} : vector<16x128xf32> to vector<1x128xf32>
    %78 = vector.broadcast %77 : vector<1x128xf32> to vector<8x128xf32>
    %79 = arith.mulf %76, %78 : vector<8x128xf32>
    %80 = arith.maximumf %46, %79 : vector<8x128xf32>
    %81 = vector.extract_strided_slice %0 {offsets = [0, 12], sizes = [8, 1], strides = [1, 1]} : vector<8x48xi32> to vector<8x1xi32>
    %82 = vector.broadcast %81 : vector<8x1xi32> to vector<8x112xi32>
    %83 = arith.cmpi eq, %11, %82 : vector<8x112xi32>
    %84 = vector.extract_strided_slice %0 {offsets = [0, 13], sizes = [8, 1], strides = [1, 1]} : vector<8x48xi32> to vector<8x1xi32>
    %85 = vector.broadcast %84 : vector<8x1xi32> to vector<8x112xi32>
    %86 = arith.cmpi eq, %11, %85 : vector<8x112xi32>
    %87 = arith.ori %83, %86 : vector<8x112xi1>
    %88 = vector.extract_strided_slice %0 {offsets = [0, 14], sizes = [8, 1], strides = [1, 1]} : vector<8x48xi32> to vector<8x1xi32>
    %89 = vector.broadcast %88 : vector<8x1xi32> to vector<8x112xi32>
    %90 = arith.cmpi eq, %11, %89 : vector<8x112xi32>
    %91 = arith.ori %87, %90 : vector<8x112xi1>
    %92 = vector.extract_strided_slice %0 {offsets = [0, 15], sizes = [8, 1], strides = [1, 1]} : vector<8x48xi32> to vector<8x1xi32>
    %93 = vector.broadcast %92 : vector<8x1xi32> to vector<8x112xi32>
    %94 = arith.cmpi eq, %11, %93 : vector<8x112xi32>
    %95 = arith.ori %91, %94 : vector<8x112xi1>
    %96 = vector.extract_strided_slice %0 {offsets = [0, 16], sizes = [8, 1], strides = [1, 1]} : vector<8x48xi32> to vector<8x1xi32>
    %97 = vector.broadcast %96 : vector<8x1xi32> to vector<8x112xi32>
    %98 = arith.cmpi eq, %11, %97 : vector<8x112xi32>
    %99 = arith.ori %95, %98 : vector<8x112xi1>
    %100 = vector.extract_strided_slice %0 {offsets = [0, 17], sizes = [8, 1], strides = [1, 1]} : vector<8x48xi32> to vector<8x1xi32>
    %101 = vector.broadcast %100 : vector<8x1xi32> to vector<8x112xi32>
    %102 = arith.cmpi eq, %11, %101 : vector<8x112xi32>
    %103 = arith.ori %99, %102 : vector<8x112xi1>
    %104 = arith.extui %103 : vector<8x112xi1> to vector<8x112xi32>
    %105 = arith.sitofp %104 : vector<8x112xi32> to vector<8x112xf32>
    %cst_14 = arith.constant dense<0.000000e+00> : vector<8x128xf32>
    %106 = tpu.matmul %105, %1, %cst_14 {dimension_numbers = #tpu.dot_dimension_numbers<[1], [0], [0], [1], [0, 0, 1, 1], [], []>} : vector<8x112xf32>, vector<112x128xf32>, vector<8x128xf32> -> vector<8x128xf32>
    %107 = vector.broadcast %7 : vector<1x128xf32> to vector<8x128xf32>
    %108 = arith.addf %106, %107 : vector<8x128xf32>
    %cst_15 = arith.constant 0.000000e+00 : f32
    %109 = vector.broadcast %cst_15 : f32 to vector<8x128xf32>
    %110 = arith.maximumf %108, %109 : vector<8x128xf32>
    %111 = vector.extract_strided_slice %6 {offsets = [10, 0], sizes = [1, 128], strides = [1, 1]} : vector<16x128xf32> to vector<1x128xf32>
    %112 = vector.broadcast %111 : vector<1x128xf32> to vector<8x128xf32>
    %113 = arith.mulf %110, %112 : vector<8x128xf32>
    %114 = arith.maximumf %80, %113 : vector<8x128xf32>
    %115 = vector.extract_strided_slice %0 {offsets = [0, 18], sizes = [8, 1], strides = [1, 1]} : vector<8x48xi32> to vector<8x1xi32>
    %116 = vector.broadcast %115 : vector<8x1xi32> to vector<8x112xi32>
    %117 = arith.cmpi eq, %11, %116 : vector<8x112xi32>
    %118 = vector.extract_strided_slice %0 {offsets = [0, 19], sizes = [8, 1], strides = [1, 1]} : vector<8x48xi32> to vector<8x1xi32>
    %119 = vector.broadcast %118 : vector<8x1xi32> to vector<8x112xi32>
    %120 = arith.cmpi eq, %11, %119 : vector<8x112xi32>
    %121 = arith.ori %117, %120 : vector<8x112xi1>
    %122 = vector.extract_strided_slice %0 {offsets = [0, 20], sizes = [8, 1], strides = [1, 1]} : vector<8x48xi32> to vector<8x1xi32>
    %123 = vector.broadcast %122 : vector<8x1xi32> to vector<8x112xi32>
    %124 = arith.cmpi eq, %11, %123 : vector<8x112xi32>
    %125 = arith.ori %121, %124 : vector<8x112xi1>
    %126 = vector.extract_strided_slice %0 {offsets = [0, 21], sizes = [8, 1], strides = [1, 1]} : vector<8x48xi32> to vector<8x1xi32>
    %127 = vector.broadcast %126 : vector<8x1xi32> to vector<8x112xi32>
    %128 = arith.cmpi eq, %11, %127 : vector<8x112xi32>
    %129 = arith.ori %125, %128 : vector<8x112xi1>
    %130 = vector.extract_strided_slice %0 {offsets = [0, 22], sizes = [8, 1], strides = [1, 1]} : vector<8x48xi32> to vector<8x1xi32>
    %131 = vector.broadcast %130 : vector<8x1xi32> to vector<8x112xi32>
    %132 = arith.cmpi eq, %11, %131 : vector<8x112xi32>
    %133 = arith.ori %129, %132 : vector<8x112xi1>
    %134 = vector.extract_strided_slice %0 {offsets = [0, 23], sizes = [8, 1], strides = [1, 1]} : vector<8x48xi32> to vector<8x1xi32>
    %135 = vector.broadcast %134 : vector<8x1xi32> to vector<8x112xi32>
    %136 = arith.cmpi eq, %11, %135 : vector<8x112xi32>
    %137 = arith.ori %133, %136 : vector<8x112xi1>
    %138 = arith.extui %137 : vector<8x112xi1> to vector<8x112xi32>
    %139 = arith.sitofp %138 : vector<8x112xi32> to vector<8x112xf32>
    %cst_16 = arith.constant dense<0.000000e+00> : vector<8x128xf32>
    %140 = tpu.matmul %139, %1, %cst_16 {dimension_numbers = #tpu.dot_dimension_numbers<[1], [0], [0], [1], [0, 0, 1, 1], [], []>} : vector<8x112xf32>, vector<112x128xf32>, vector<8x128xf32> -> vector<8x128xf32>
    %141 = vector.broadcast %7 : vector<1x128xf32> to vector<8x128xf32>
    %142 = arith.addf %140, %141 : vector<8x128xf32>
    %cst_17 = arith.constant 0.000000e+00 : f32
    %143 = vector.broadcast %cst_17 : f32 to vector<8x128xf32>
    %144 = arith.maximumf %142, %143 : vector<8x128xf32>
    %145 = vector.extract_strided_slice %6 {offsets = [11, 0], sizes = [1, 128], strides = [1, 1]} : vector<16x128xf32> to vector<1x128xf32>
    %146 = vector.broadcast %145 : vector<1x128xf32> to vector<8x128xf32>
    %147 = arith.mulf %144, %146 : vector<8x128xf32>
    %148 = arith.maximumf %114, %147 : vector<8x128xf32>
    %149 = vector.extract_strided_slice %0 {offsets = [0, 24], sizes = [8, 1], strides = [1, 1]} : vector<8x48xi32> to vector<8x1xi32>
    %150 = vector.broadcast %149 : vector<8x1xi32> to vector<8x112xi32>
    %151 = arith.cmpi eq, %11, %150 : vector<8x112xi32>
    %152 = vector.extract_strided_slice %0 {offsets = [0, 25], sizes = [8, 1], strides = [1, 1]} : vector<8x48xi32> to vector<8x1xi32>
    %153 = vector.broadcast %152 : vector<8x1xi32> to vector<8x112xi32>
    %154 = arith.cmpi eq, %11, %153 : vector<8x112xi32>
    %155 = arith.ori %151, %154 : vector<8x112xi1>
    %156 = vector.extract_strided_slice %0 {offsets = [0, 26], sizes = [8, 1], strides = [1, 1]} : vector<8x48xi32> to vector<8x1xi32>
    %157 = vector.broadcast %156 : vector<8x1xi32> to vector<8x112xi32>
    %158 = arith.cmpi eq, %11, %157 : vector<8x112xi32>
    %159 = arith.ori %155, %158 : vector<8x112xi1>
    %160 = vector.extract_strided_slice %0 {offsets = [0, 27], sizes = [8, 1], strides = [1, 1]} : vector<8x48xi32> to vector<8x1xi32>
    %161 = vector.broadcast %160 : vector<8x1xi32> to vector<8x112xi32>
    %162 = arith.cmpi eq, %11, %161 : vector<8x112xi32>
    %163 = arith.ori %159, %162 : vector<8x112xi1>
    %164 = vector.extract_strided_slice %0 {offsets = [0, 28], sizes = [8, 1], strides = [1, 1]} : vector<8x48xi32> to vector<8x1xi32>
    %165 = vector.broadcast %164 : vector<8x1xi32> to vector<8x112xi32>
    %166 = arith.cmpi eq, %11, %165 : vector<8x112xi32>
    %167 = arith.ori %163, %166 : vector<8x112xi1>
    %168 = vector.extract_strided_slice %0 {offsets = [0, 29], sizes = [8, 1], strides = [1, 1]} : vector<8x48xi32> to vector<8x1xi32>
    %169 = vector.broadcast %168 : vector<8x1xi32> to vector<8x112xi32>
    %170 = arith.cmpi eq, %11, %169 : vector<8x112xi32>
    %171 = arith.ori %167, %170 : vector<8x112xi1>
    %172 = arith.extui %171 : vector<8x112xi1> to vector<8x112xi32>
    %173 = arith.sitofp %172 : vector<8x112xi32> to vector<8x112xf32>
    %cst_18 = arith.constant dense<0.000000e+00> : vector<8x128xf32>
    %174 = tpu.matmul %173, %1, %cst_18 {dimension_numbers = #tpu.dot_dimension_numbers<[1], [0], [0], [1], [0, 0, 1, 1], [], []>} : vector<8x112xf32>, vector<112x128xf32>, vector<8x128xf32> -> vector<8x128xf32>
    %175 = vector.broadcast %7 : vector<1x128xf32> to vector<8x128xf32>
    %176 = arith.addf %174, %175 : vector<8x128xf32>
    %cst_19 = arith.constant 0.000000e+00 : f32
    %177 = vector.broadcast %cst_19 : f32 to vector<8x128xf32>
    %178 = arith.maximumf %176, %177 : vector<8x128xf32>
    %179 = vector.extract_strided_slice %6 {offsets = [12, 0], sizes = [1, 128], strides = [1, 1]} : vector<16x128xf32> to vector<1x128xf32>
    %180 = vector.broadcast %179 : vector<1x128xf32> to vector<8x128xf32>
    %181 = arith.mulf %178, %180 : vector<8x128xf32>
    %182 = arith.maximumf %148, %181 : vector<8x128xf32>
    %183 = vector.extract_strided_slice %0 {offsets = [0, 30], sizes = [8, 1], strides = [1, 1]} : vector<8x48xi32> to vector<8x1xi32>
    %184 = vector.broadcast %183 : vector<8x1xi32> to vector<8x112xi32>
    %185 = arith.cmpi eq, %11, %184 : vector<8x112xi32>
    %186 = vector.extract_strided_slice %0 {offsets = [0, 31], sizes = [8, 1], strides = [1, 1]} : vector<8x48xi32> to vector<8x1xi32>
    %187 = vector.broadcast %186 : vector<8x1xi32> to vector<8x112xi32>
    %188 = arith.cmpi eq, %11, %187 : vector<8x112xi32>
    %189 = arith.ori %185, %188 : vector<8x112xi1>
    %190 = vector.extract_strided_slice %0 {offsets = [0, 32], sizes = [8, 1], strides = [1, 1]} : vector<8x48xi32> to vector<8x1xi32>
    %191 = vector.broadcast %190 : vector<8x1xi32> to vector<8x112xi32>
    %192 = arith.cmpi eq, %11, %191 : vector<8x112xi32>
    %193 = arith.ori %189, %192 : vector<8x112xi1>
    %194 = vector.extract_strided_slice %0 {offsets = [0, 33], sizes = [8, 1], strides = [1, 1]} : vector<8x48xi32> to vector<8x1xi32>
    %195 = vector.broadcast %194 : vector<8x1xi32> to vector<8x112xi32>
    %196 = arith.cmpi eq, %11, %195 : vector<8x112xi32>
    %197 = arith.ori %193, %196 : vector<8x112xi1>
    %198 = vector.extract_strided_slice %0 {offsets = [0, 34], sizes = [8, 1], strides = [1, 1]} : vector<8x48xi32> to vector<8x1xi32>
    %199 = vector.broadcast %198 : vector<8x1xi32> to vector<8x112xi32>
    %200 = arith.cmpi eq, %11, %199 : vector<8x112xi32>
    %201 = arith.ori %197, %200 : vector<8x112xi1>
    %202 = vector.extract_strided_slice %0 {offsets = [0, 35], sizes = [8, 1], strides = [1, 1]} : vector<8x48xi32> to vector<8x1xi32>
    %203 = vector.broadcast %202 : vector<8x1xi32> to vector<8x112xi32>
    %204 = arith.cmpi eq, %11, %203 : vector<8x112xi32>
    %205 = arith.ori %201, %204 : vector<8x112xi1>
    %206 = arith.extui %205 : vector<8x112xi1> to vector<8x112xi32>
    %207 = arith.sitofp %206 : vector<8x112xi32> to vector<8x112xf32>
    %cst_20 = arith.constant dense<0.000000e+00> : vector<8x128xf32>
    %208 = tpu.matmul %207, %1, %cst_20 {dimension_numbers = #tpu.dot_dimension_numbers<[1], [0], [0], [1], [0, 0, 1, 1], [], []>} : vector<8x112xf32>, vector<112x128xf32>, vector<8x128xf32> -> vector<8x128xf32>
    %209 = vector.broadcast %7 : vector<1x128xf32> to vector<8x128xf32>
    %210 = arith.addf %208, %209 : vector<8x128xf32>
    %cst_21 = arith.constant 0.000000e+00 : f32
    %211 = vector.broadcast %cst_21 : f32 to vector<8x128xf32>
    %212 = arith.maximumf %210, %211 : vector<8x128xf32>
    %213 = vector.extract_strided_slice %6 {offsets = [13, 0], sizes = [1, 128], strides = [1, 1]} : vector<16x128xf32> to vector<1x128xf32>
    %214 = vector.broadcast %213 : vector<1x128xf32> to vector<8x128xf32>
    %215 = arith.mulf %212, %214 : vector<8x128xf32>
    %216 = arith.maximumf %182, %215 : vector<8x128xf32>
    %217 = vector.extract_strided_slice %0 {offsets = [0, 36], sizes = [8, 1], strides = [1, 1]} : vector<8x48xi32> to vector<8x1xi32>
    %218 = vector.broadcast %217 : vector<8x1xi32> to vector<8x112xi32>
    %219 = arith.cmpi eq, %11, %218 : vector<8x112xi32>
    %220 = vector.extract_strided_slice %0 {offsets = [0, 37], sizes = [8, 1], strides = [1, 1]} : vector<8x48xi32> to vector<8x1xi32>
    %221 = vector.broadcast %220 : vector<8x1xi32> to vector<8x112xi32>
    %222 = arith.cmpi eq, %11, %221 : vector<8x112xi32>
    %223 = arith.ori %219, %222 : vector<8x112xi1>
    %224 = vector.extract_strided_slice %0 {offsets = [0, 38], sizes = [8, 1], strides = [1, 1]} : vector<8x48xi32> to vector<8x1xi32>
    %225 = vector.broadcast %224 : vector<8x1xi32> to vector<8x112xi32>
    %226 = arith.cmpi eq, %11, %225 : vector<8x112xi32>
    %227 = arith.ori %223, %226 : vector<8x112xi1>
    %228 = vector.extract_strided_slice %0 {offsets = [0, 39], sizes = [8, 1], strides = [1, 1]} : vector<8x48xi32> to vector<8x1xi32>
    %229 = vector.broadcast %228 : vector<8x1xi32> to vector<8x112xi32>
    %230 = arith.cmpi eq, %11, %229 : vector<8x112xi32>
    %231 = arith.ori %227, %230 : vector<8x112xi1>
    %232 = vector.extract_strided_slice %0 {offsets = [0, 40], sizes = [8, 1], strides = [1, 1]} : vector<8x48xi32> to vector<8x1xi32>
    %233 = vector.broadcast %232 : vector<8x1xi32> to vector<8x112xi32>
    %234 = arith.cmpi eq, %11, %233 : vector<8x112xi32>
    %235 = arith.ori %231, %234 : vector<8x112xi1>
    %236 = vector.extract_strided_slice %0 {offsets = [0, 41], sizes = [8, 1], strides = [1, 1]} : vector<8x48xi32> to vector<8x1xi32>
    %237 = vector.broadcast %236 : vector<8x1xi32> to vector<8x112xi32>
    %238 = arith.cmpi eq, %11, %237 : vector<8x112xi32>
    %239 = arith.ori %235, %238 : vector<8x112xi1>
    %240 = arith.extui %239 : vector<8x112xi1> to vector<8x112xi32>
    %241 = arith.sitofp %240 : vector<8x112xi32> to vector<8x112xf32>
    %cst_22 = arith.constant dense<0.000000e+00> : vector<8x128xf32>
    %242 = tpu.matmul %241, %1, %cst_22 {dimension_numbers = #tpu.dot_dimension_numbers<[1], [0], [0], [1], [0, 0, 1, 1], [], []>} : vector<8x112xf32>, vector<112x128xf32>, vector<8x128xf32> -> vector<8x128xf32>
    %243 = vector.broadcast %7 : vector<1x128xf32> to vector<8x128xf32>
    %244 = arith.addf %242, %243 : vector<8x128xf32>
    %cst_23 = arith.constant 0.000000e+00 : f32
    %245 = vector.broadcast %cst_23 : f32 to vector<8x128xf32>
    %246 = arith.maximumf %244, %245 : vector<8x128xf32>
    %247 = vector.extract_strided_slice %6 {offsets = [14, 0], sizes = [1, 128], strides = [1, 1]} : vector<16x128xf32> to vector<1x128xf32>
    %248 = vector.broadcast %247 : vector<1x128xf32> to vector<8x128xf32>
    %249 = arith.mulf %246, %248 : vector<8x128xf32>
    %250 = arith.maximumf %216, %249 : vector<8x128xf32>
    %251 = vector.extract_strided_slice %0 {offsets = [0, 42], sizes = [8, 1], strides = [1, 1]} : vector<8x48xi32> to vector<8x1xi32>
    %252 = vector.broadcast %251 : vector<8x1xi32> to vector<8x112xi32>
    %253 = arith.cmpi eq, %11, %252 : vector<8x112xi32>
    %254 = vector.extract_strided_slice %0 {offsets = [0, 43], sizes = [8, 1], strides = [1, 1]} : vector<8x48xi32> to vector<8x1xi32>
    %255 = vector.broadcast %254 : vector<8x1xi32> to vector<8x112xi32>
    %256 = arith.cmpi eq, %11, %255 : vector<8x112xi32>
    %257 = arith.ori %253, %256 : vector<8x112xi1>
    %258 = vector.extract_strided_slice %0 {offsets = [0, 44], sizes = [8, 1], strides = [1, 1]} : vector<8x48xi32> to vector<8x1xi32>
    %259 = vector.broadcast %258 : vector<8x1xi32> to vector<8x112xi32>
    %260 = arith.cmpi eq, %11, %259 : vector<8x112xi32>
    %261 = arith.ori %257, %260 : vector<8x112xi1>
    %262 = vector.extract_strided_slice %0 {offsets = [0, 45], sizes = [8, 1], strides = [1, 1]} : vector<8x48xi32> to vector<8x1xi32>
    %263 = vector.broadcast %262 : vector<8x1xi32> to vector<8x112xi32>
    %264 = arith.cmpi eq, %11, %263 : vector<8x112xi32>
    %265 = arith.ori %261, %264 : vector<8x112xi1>
    %266 = vector.extract_strided_slice %0 {offsets = [0, 46], sizes = [8, 1], strides = [1, 1]} : vector<8x48xi32> to vector<8x1xi32>
    %267 = vector.broadcast %266 : vector<8x1xi32> to vector<8x112xi32>
    %268 = arith.cmpi eq, %11, %267 : vector<8x112xi32>
    %269 = arith.ori %265, %268 : vector<8x112xi1>
    %270 = vector.extract_strided_slice %0 {offsets = [0, 47], sizes = [8, 1], strides = [1, 1]} : vector<8x48xi32> to vector<8x1xi32>
    %271 = vector.broadcast %270 : vector<8x1xi32> to vector<8x112xi32>
    %272 = arith.cmpi eq, %11, %271 : vector<8x112xi32>
    %273 = arith.ori %269, %272 : vector<8x112xi1>
    %274 = arith.extui %273 : vector<8x112xi1> to vector<8x112xi32>
    %275 = arith.sitofp %274 : vector<8x112xi32> to vector<8x112xf32>
    %cst_24 = arith.constant dense<0.000000e+00> : vector<8x128xf32>
    %276 = tpu.matmul %275, %1, %cst_24 {dimension_numbers = #tpu.dot_dimension_numbers<[1], [0], [0], [1], [0, 0, 1, 1], [], []>} : vector<8x112xf32>, vector<112x128xf32>, vector<8x128xf32> -> vector<8x128xf32>
    %277 = vector.broadcast %7 : vector<1x128xf32> to vector<8x128xf32>
    %278 = arith.addf %276, %277 : vector<8x128xf32>
    %cst_25 = arith.constant 0.000000e+00 : f32
    %279 = vector.broadcast %cst_25 : f32 to vector<8x128xf32>
    %280 = arith.maximumf %278, %279 : vector<8x128xf32>
    %281 = vector.extract_strided_slice %6 {offsets = [15, 0], sizes = [1, 128], strides = [1, 1]} : vector<16x128xf32> to vector<1x128xf32>
    %282 = vector.broadcast %281 : vector<1x128xf32> to vector<8x128xf32>
    %283 = arith.mulf %280, %282 : vector<8x128xf32>
    %284 = arith.maximumf %250, %283 : vector<8x128xf32>
    %cst_26 = arith.constant dense<0.000000e+00> : vector<8x128xf32>
    %285 = tpu.matmul %284, %3, %cst_26 {dimension_numbers = #tpu.dot_dimension_numbers<[1], [0], [0], [1], [0, 0, 1, 1], [], []>} : vector<8x128xf32>, vector<128x128xf32>, vector<8x128xf32> -> vector<8x128xf32>
    %286 = vector.broadcast %8 : vector<1x128xf32> to vector<8x128xf32>
    %287 = arith.addf %285, %286 : vector<8x128xf32>
    %288 = arith.negf %287 : vector<8x128xf32>
    %289 = math.exp %288 : vector<8x128xf32>
    %cst_27 = arith.constant 1.000000e+00 : f32
    %290 = vector.broadcast %cst_27 : f32 to vector<8x128xf32>
    %291 = arith.addf %290, %289 : vector<8x128xf32>
    %292 = arith.divf %290, %291 : vector<8x128xf32>
    %cst_28 = arith.constant 0.000000e+00 : f32
    %293 = vector.broadcast %cst_28 : f32 to vector<8x128xf32>
    %294 = arith.maximumf %287, %293 : vector<8x128xf32>
    %295 = arith.mulf %292, %294 : vector<8x128xf32>
    %cst_29 = arith.constant 1.000000e+00 : f32
    %296 = vector.broadcast %cst_29 : f32 to vector<8x128xf32>
    %297 = arith.subf %296, %292 : vector<8x128xf32>
    %298 = arith.mulf %297, %284 : vector<8x128xf32>
    %299 = arith.addf %295, %298 : vector<8x128xf32>
    %cst_30 = arith.constant dense<0.000000e+00> : vector<8x128xf32>
    %300 = tpu.matmul %299, %5, %cst_30 {dimension_numbers = #tpu.dot_dimension_numbers<[1], [0], [0], [1], [0, 0, 1, 1], [], []>} : vector<8x128xf32>, vector<128x128xf32>, vector<8x128xf32> -> vector<8x128xf32>
    %301 = vector.broadcast %9 : vector<1x128xf32> to vector<8x128xf32>
    %302 = arith.addf %300, %301 : vector<8x128xf32>
    %cst_31 = arith.constant 5.000000e-01 : f32
    %303 = vector.broadcast %cst_31 : f32 to vector<1x128xf32>
    %304 = arith.cmpf ogt, %10, %303 : vector<1x128xf32>
    %cst_32 = arith.constant -1.000000e+30 : f32
    %305 = vector.shape_cast %304 : vector<1x128xi1> to vector<1x128xi1>
    %306 = vector.broadcast %305 : vector<1x128xi1> to vector<8x128xi1>
    %307 = vector.broadcast %cst_32 : f32 to vector<8x128xf32>
    %308 = arith.select %306, %302, %307 : vector<8x128xi1>, vector<8x128xf32>
    %cst_33 = arith.constant dense<0xFF800000> : vector<8xf32>
    %309 = vector.multi_reduction <maximumf>, %308, %cst_33 [1] : vector<8x128xf32> to vector<8xf32>
    %310 = vector.shape_cast %309 : vector<8xf32> to vector<8x1xf32>
    %311 = vector.broadcast %310 : vector<8x1xf32> to vector<8x128xf32>
    %312 = arith.subf %308, %311 : vector<8x128xf32>
    %313 = math.exp %312 : vector<8x128xf32>
    %cst_34 = arith.constant dense<0.000000e+00> : vector<8xf32>
    %314 = vector.multi_reduction <add>, %313, %cst_34 [1] : vector<8x128xf32> to vector<8xf32>
    %315 = vector.shape_cast %314 : vector<8xf32> to vector<8x1xf32>
    %316 = math.log %315 : vector<8x1xf32>
    %317 = arith.addf %310, %316 : vector<8x1xf32>
    %318 = vector.broadcast %317 : vector<8x1xf32> to vector<8x128xf32>
    %319 = arith.subf %308, %318 : vector<8x128xf32>
    %c0_35 = arith.constant 0 : index
    %c0_36 = arith.constant 0 : index
    %320 = vector.load %arg5[%c0_35, %c0_36] : memref<8x128xf32, #tpu.memory_space<vmem>>, vector<8x128xf32>
    tpu.vector_store %arg5[%c0_35, %c0_36], %319 {strides = array<i32>} : memref<8x128xf32, #tpu.memory_space<vmem>>, vector<8x128xf32>,
    return
  }
  func.func @transform_0(%arg0: i32) -> (i32, i32) {
    %c0_i32 = arith.constant 0 : i32
    %c0_i32_0 = arith.constant 0 : i32
    return %arg0, %c0_i32 : i32, i32
  }
  func.func @transform_1(%arg0: i32) -> (i32, i32) {
    %c0_i32 = arith.constant 0 : i32
    %c0_i32_0 = arith.constant 0 : i32
    %c0_i32_1 = arith.constant 0 : i32
    return %c0_i32, %c0_i32_0 : i32, i32
  }
  func.func @transform_2(%arg0: i32) -> (i32, i32, i32) {
    %c0_i32 = arith.constant 0 : i32
    %c0_i32_0 = arith.constant 0 : i32
    %c0_i32_1 = arith.constant 0 : i32
    %c0_i32_2 = arith.constant 0 : i32
    return %c0_i32, %c0_i32_0, %c0_i32_1 : i32, i32, i32
  }
  func.func @transform_3(%arg0: i32) -> (i32, i32) {
    %c0_i32 = arith.constant 0 : i32
    %c0_i32_0 = arith.constant 0 : i32
    %c0_i32_1 = arith.constant 0 : i32
    return %c0_i32, %c0_i32_0 : i32, i32
  }
  func.func @transform_4(%arg0: i32) -> (i32, i32) {
    %c0_i32 = arith.constant 0 : i32
    %c0_i32_0 = arith.constant 0 : i32
    return %arg0, %c0_i32 : i32, i32
  }
}

</mosaic_0001>

<bundles_post_ra>
// kernel: tpu_custom_call.1
= control target key start
LH: loop header
LB: loop body
LE: loop exit
PB: predicated region body
PF: predicated region fallthrough
CT: control target
= control target key end

     0   :  { %9 = vsyncpa [#allocation3], 0  ;;  %s2631_s0 = inlined_call_operand.hbm [shape: s32[8,48], index: 0, kind: input, shape index: {}]   ;;  %s2632_s1 = inlined_call_operand.hbm [shape: f32[112,128], index: 1, kind: input, shape index: {}]   ;;  %s2633_s2 = inlined_call_operand.hbm [shape: f32[2,128,128], index: 2, kind: input, shape index: {}]   ;;  %s2634_s3 = inlined_call_operand.hbm [shape: f32[16,128], index: 3, kind: input, shape index: {}]   ;;  %s2635_s4 = inlined_call_operand.hbm [shape: f32[8,128], index: 4, kind: output, shape index: {}]  }
   0x1   :  { %10 = vsyncpa [#allocation6], 0 }
   0x2   :  { %11 = vsyncpa [#allocation9], 0 }
   0x3   :  { %12 = vsyncpa [#allocation4], 0  ;;  %s2149_s15 = smov [#allocation5]   ;;  %s2031_s19 = scalar_lea.hbm %s2632_s1, 1792 }
   0x4   :  { %s28_s16 = sshll.u32 %s2149_s15, 4  ;;  %p2032_p0 = scmp.ne.s32.totalorder %s2632_s1, %s2031_s19  ;;  %s29_s16 = int_to_ptr.vmem [resolvable:$true] %s28_s16 }
   0x5   :  { %p2035_p1 = scmp.lt.u32.totalorder %s2031_s19, %s2632_s1 }
   0x7   :  { %p2037_p2 = pnand %p2035_p1, %p2032_p0 }
   0x9   :  { %2040 = shalt.err (!%p2037_p2)
}
   0xa   :  { %s2041_s24 = scalar_lea.vmem %s29_s16, 1792  ;;  %p2046_p4 = scmp.lt.s32.totalorder %s29_s16, %s29_s16 }
   0xb   :  { %p2042_p3 = scmp.ne.s32.totalorder %s29_s16, %s2041_s24  ;;  %p2047_p5 = scmp.lt.s32.totalorder %s2041_s24, %s2041_s24 }
   0xd   :  { %p2048_p6 = por %p2047_p5, %p2046_p4 }
   0xf   :  { %p2049_p7 = pnand %p2048_p6, %p2042_p3 }
  0x11   :  { %2052 = shalt.err (!%p2049_p7)
}
  0x12   :  { %s2150_s25 = smov 128   ;;  %s2151_s26 = smov 8  }
  0x13   :  { %34 = dma.hbm_to_vmem [thread:$0]  %s2632_s1, 1792, %s29_s16, [#allocation6], %s2150_s25, %s2150_s25, %s2151_s26  }
  0x14   :  { %s2152_s29 = smov [#allocation2]   ;;  %s2153_s5 = smov [#allocation7]  }
  0x15   :  { %s19_s30 = sshll.u32 %s2152_s29, 4  ;;  %s40_s6 = sshll.u32 %s2153_s5, 4  ;;  %s20_s30 = int_to_ptr.vmem [resolvable:$true] %s19_s30  ;;  %s41_s6 = int_to_ptr.vmem [resolvable:$true] %s40_s6 }
  0x16   :  { %s2053_s9 = scalar_lea.hbm %s2631_s0, 128 }
  0x17   :  { %p2054_p8 = scmp.ne.s32.totalorder %s2631_s0, %s2053_s9  ;;  %p2057_p9 = scmp.lt.u32.totalorder %s2053_s9, %s2631_s0 }
  0x19   :  { %p2059_p10 = pnand %p2057_p9, %p2054_p8 }
  0x1b   :  { %2062 = shalt.err (!%p2059_p10)
}
  0x1c   :  { %s2063_s1 = scalar_lea.vmem %s20_s30, 128  ;;  %p2068_p12 = scmp.lt.s32.totalorder %s20_s30, %s20_s30 }
  0x1d   :  { %p2064_p11 = scmp.ne.s32.totalorder %s20_s30, %s2063_s1  ;;  %p2069_p13 = scmp.lt.s32.totalorder %s2063_s1, %s2063_s1 }
  0x1f   :  { %p2070_p0 = por %p2069_p13, %p2068_p12 }
  0x21   :  { %p2071_p1 = pnand %p2070_p0, %p2064_p11 }
  0x23   :  { %2074 = shalt.err (!%p2071_p1)
}
  0x24   :  { %22 = dma.hbm_to_vmem [thread:$0]  %s2631_s0, 128, %s20_s30, [#allocation3]  }
  0x25   :  { %s2075_s18 = scalar_lea.hbm %s2633_s2, 4096 }
  0x26   :  { %p2076_p2 = scmp.ne.s32.totalorder %s2633_s2, %s2075_s18  ;;  %p2079_p3 = scmp.lt.u32.totalorder %s2075_s18, %s2633_s2 }
  0x28   :  { %p2081_p4 = pnand %p2079_p3, %p2076_p2 }
  0x2a   :  { %2084 = shalt.err (!%p2081_p4)
}
  0x2b   :  { %s2085_s23 = scalar_lea.vmem %s41_s6, 4096  ;;  %p2090_p6 = scmp.lt.s32.totalorder %s41_s6, %s41_s6 }
  0x2c   :  { %p2086_p5 = scmp.ne.s32.totalorder %s41_s6, %s2085_s23  ;;  %p2091_p7 = scmp.lt.s32.totalorder %s2085_s23, %s2085_s23 }
  0x2e   :  { %p2092_p8 = por %p2091_p7, %p2090_p6 }
  0x30   :  { %p2093_p9 = pnand %p2092_p8, %p2086_p5 }
  0x32   :  { %2096 = shalt.err (!%p2093_p9)
}
  0x33   :  { %46 = dma.hbm_to_vmem [thread:$0]  %s2633_s2, 4096, %s41_s6, [#allocation6], %s2150_s25, %s2150_s25, %s2151_s26  }
  0x34   :  { %s2154_s27 = smov [#allocation8]   ;;  %s2097_s5 = scalar_lea.hbm %s2634_s3, 256 }
  0x35   :  { %s52_s28 = sshll.u32 %s2154_s27, 4  ;;  %p2098_p10 = scmp.ne.s32.totalorder %s2634_s3, %s2097_s5  ;;  %s53_s28 = int_to_ptr.vmem [resolvable:$true] %s52_s28 }
  0x36   :  { %p2101_p11 = scmp.lt.u32.totalorder %s2097_s5, %s2634_s3 }
  0x38   :  { %p2103_p12 = pnand %p2101_p11, %p2098_p10 }
  0x3a   :  { %2106 = shalt.err (!%p2103_p12)
}
  0x3b   :  { %s2107_s11 = scalar_lea.vmem %s53_s28, 256  ;;  %p2112_p0 = scmp.lt.s32.totalorder %s53_s28, %s53_s28 }
  0x3c   :  { %p2108_p13 = scmp.ne.s32.totalorder %s53_s28, %s2107_s11  ;;  %p2113_p1 = scmp.lt.s32.totalorder %s2107_s11, %s2107_s11 }
  0x3e   :  { %p2114_p2 = por %p2113_p1, %p2112_p0 }
  0x40   :  { %p2115_p3 = pnand %p2114_p2, %p2108_p13 }
  0x42   :  { %2118 = shalt.err (!%p2115_p3)
}
  0x43   :  { %58 = dma.hbm_to_vmem [thread:$0]  %s2634_s3, 256, %s53_s28, [#allocation9], %s2150_s25, %s2150_s25, %s2151_s26  }
  0x44   :  { %2141 = dma.done.wait [#allocation3], 128  }
  0x45   :  { %2142 = vsyncadd [#allocation3], 4294967168 }
  0x46   :  { %2143 = dma.done.wait [#allocation6], 5888  }
  0x47   :  { %2144 = vsyncadd [#allocation6], 4294961408 }
  0x48   :  { %2145 = dma.done.wait [#allocation9], 256  }
  0x49   :  { %2146 = vsyncadd [#allocation9], 4294967040  ;;  %v2155_v0 = vmov 2   ;;  %v2156_v1 = vmov 0   ;;  %v2290_v2 = vld [vmem:[#allocation2] sm:$0xff]  ;;  %v72_v3 = vld [vmem:[#allocation5] sm:$0xff] }
  0x4a   :  { %1977 = vset.pattern.permute.xlu1 %v2155_v0  ;;  %1975 = vset.pattern.permute.xlu0 %v2156_v1  ;;  %v73_v4 = vld [vmem:[#allocation5 + $0x8] sm:$0xff]  ;;  %v2157_v6 = vmov 3   ;;  %v2158_v7 = vmov 1   ;;  %v74_v8 = vld [vmem:[#allocation5 + $0x10] sm:$0xff]  ;;  %v75_v9 = vld [vmem:[#allocation5 + $0x18] sm:$0xff]  ;;  %v2159_v10 = vmov 0.0|0.0  }
  0x4b   :  { %133 = vperm.xlu1 %1977, %v2290_v2   ;;  %124 = vperm.xlu0 %1975, %v2290_v2   ;;  %v2294_v5 = vpack.c.bf16 %v73_v4, %v72_v3  ;;  %v2301_v11 = vpack.c.bf16 %v75_v9, %v74_v8  ;;  %v2160_v12 = vmov 6   ;;  %v2161_v13 = vmov 7   ;;  %v76_v14 = vld [vmem:[#allocation5 + $0x20] sm:$0xff]  ;;  %v77_v15 = vld [vmem:[#allocation5 + $0x28] sm:$0xff]  ;;  %v78_v19 = vld [vmem:[#allocation5 + $0x30] sm:$0xff]  ;;  %s2206_s3 = smov [#allocation10]  }
  0x4c   :  { %1701 = vmatprep.subr.bf16.mxu0 %v2159_v10  ;;  %1722 = vmatprep.subr.bf16.mxu1 %v2159_v10  ;;  %v2311_v16 = vpack.c.bf16 %v77_v15, %v76_v14  ;;  %v2162_v17 = vmov 4   ;;  %v2163_v18 = vmov 5   ;;  %v79_v20 = vld [vmem:[#allocation5 + $0x38] sm:$0xff]  ;;  %vm2164_vm0 = vmmov 0   ;;  %v80_v25 = vld [vmem:[#allocation5 + $0x40] sm:$0xff]  ;;  %v81_v26 = vld [vmem:[#allocation5 + $0x48] sm:$0xff] }
  0x4d   :  { %1703 = vmatpush3.bf16.msra.mxu0 %v2294_v5  ;;  %1724 = vmatpush3.bf16.msra.mxu1 %v2294_v5  ;;  %v2319_v21 = vpack.c.bf16 %v79_v20, %v78_v19  ;;  %v2165_v22 = vmov 0.0   ;;  %v2166_v23 = vmov 8   ;;  %v2167_v24 = vmov 11   ;;  %v82_v30 = vld [vmem:[#allocation5 + $0x50] sm:$0xff]  ;;  %v83_v31 = vld [vmem:[#allocation5 + $0x58] sm:$0xff]  ;;  %v84_v35 = vld [vmem:[#allocation5 + $0x60] sm:$0xff] }
  0x4e   :  { %1704 = vmatprep.subr.bf16.mxu0 %v2159_v10  ;;  %1725 = vmatprep.subr.bf16.mxu1 %v2159_v10  ;;  %v2331_v27 = vpack.c.bf16 %v81_v26, %v80_v25  ;;  %v2168_v28 = vmov 9   ;;  %v2169_v29 = vmov 14   ;;  %v2339_v32 = vpack.c.bf16 %v83_v31, %v82_v30  ;;  %v85_v36 = vld [vmem:[#allocation5 + $0x68] sm:$0xff]  ;;  %s1201_s25 = sshll.u32 %s2206_s3, 4  ;;  %s1202_s25 = int_to_ptr.vmem [resolvable:$true] %s1201_s25 }
  0x4f   :  { %1978 = vset.pattern.permute.xlu1 %v2157_v6  ;;  %1976 = vset.pattern.permute.xlu0 %v2158_v7  ;;  %v2170_v33 = vmov 10   ;;  %v2171_v34 = vmov 19   ;;  %v2347_v37 = vpack.c.bf16 %v85_v36, %v84_v35  ;;  %v2172_v38 = vmov 12   ;;  %s2119_s26 = scalar_lea.vmem %s1202_s25, 128  ;;  %p2124_p5 = scmp.lt.s32.totalorder %s1202_s25, %s1202_s25 }
  0x50   :  { %138 = vperm.xlu1 %1978, %v2290_v2   ;;  %128 = vperm.xlu0 %1976, %v2290_v2   ;;  %v2173_v39 = vmov 17   ;;  %v2174_v40 = vmov 13   ;;  %v2175_v41 = vmov 23   ;;  %v2176_v42 = vmov 15   ;;  %p2120_p4 = scmp.ne.s32.totalorder %s1202_s25, %s2119_s26  ;;  %p2125_p6 = scmp.lt.s32.totalorder %s2119_s26, %s2119_s26 }
  0x51   :  { %1706 = vmatpush3.bf16.msra.mxu0 %v2301_v11  ;;  %1727 = vmatpush3.bf16.msra.mxu1 %v2301_v11  ;;  %v2177_v43 = vmov 26   ;;  %v2178_v44 = vmov 18   ;;  %v2179_v45 = vmov 31   ;;  %v2180_v46 = vmov 16  }
  0x52   :  { %1707 = vmatprep.subr.bf16.mxu0 %v2159_v10  ;;  %1728 = vmatprep.subr.bf16.mxu1 %v2159_v10  ;;  %v2181_v47 = vmov 29   ;;  %v2182_v48 = vmov 20   ;;  %v2183_v49 = vmov 35   ;;  %v2184_v50 = vmov 21   ;;  %p2126_p7 = por %p2125_p6, %p2124_p5 }
  0x53   :  { %1411 = vmatprep.mubr.msk.f32.mxu0 %vm2164_vm0, %v2165_v22  ;;  %1442 = vmatprep.mubr.msk.f32.mxu1 %vm2164_vm0, %v2165_v22  ;;  %v2185_v51 = vmov 38   ;;  %v2186_v52 = vmov 22   ;;  %v2187_v53 = vmov 43   ;;  %v2188_v54 = vmov 24  }
  0x54   :  { %1979 = vset.pattern.permute.xlu1 %v2160_v12  ;;  %1980 = vset.pattern.permute.xlu0 %v2161_v13  ;;  %v2189_v55 = vmov 41   ;;  %v2190_v56 = vmov 25   ;;  %v2191_v57 = vmov 47   ;;  %v2192_v58 = vmov 27   ;;  %p2127_p8 = pnand %p2126_p7, %p2120_p4 }
  0x55   :  { %240 = vperm.xlu1 %1979, %v2290_v2   ;;  %244 = vperm.xlu0 %1980, %v2290_v2   ;;  %v2193_v59 = vmov 30   ;;  %v2194_v60 = vmov 28   ;;  %v2195_v61 = vmov 32   ;;  %v2196_v62 = vmov 33  }
  0x56   :  { %1709 = vmatpush3.bf16.msra.mxu0 %v2311_v16  ;;  %1730 = vmatpush3.bf16.msra.mxu1 %v2311_v16  ;;  %v2197_v63 = vmov 34   ;;  %v2198_v0 = vmov 36   ;;  %v2199_v3 = vmov 37   ;;  %v2200_v4 = vmov 39  }
  0x57   :  { %1710 = vmatprep.subr.bf16.mxu0 %v2159_v10  ;;  %1731 = vmatprep.subr.bf16.mxu1 %v2159_v10  ;;  %v121_v8 = vlaneseq  ;;  %v2201_v9 = vmov 42   ;;  %v2202_v15 = vmov 40   ;;  %v2203_v19 = vmov 44  }
  0x58   :  { %vm158_vm11 = vcmask 916480  }
  0x59   :  { %1981 = vset.pattern.permute.xlu1 %v2162_v17  ;;  %1983 = vset.pattern.permute.xlu0 %v2163_v18  ;;  %v2385_v12 = vand.u32 127, %v121_v8 }
  0x5a   :  { %143 = vperm.xlu1 %1981, %v2290_v2   ;;  %148 = vperm.xlu0 %1983, %v2290_v2  }
  0x5b   :  { %1712 = vmatpush3.bf16.msra.mxu0 %v2319_v21  ;;  %1733 = vmatpush3.bf16.msra.mxu1 %v2319_v21 }
  0x5c   :  { %1713 = vmatprep.subr.bf16.mxu0 %v2159_v10  ;;  %1734 = vmatprep.subr.bf16.mxu1 %v2159_v10 }
  0x5e   :  { %1982 = vset.pattern.permute.xlu1 %v2166_v23  ;;  %1986 = vset.pattern.permute.xlu0 %v2167_v24  ;;  %v2204_v24 = vmov 45  }
  0x5f   :  { %249 = vperm.xlu1 %1982, %v2290_v2   ;;  %264 = vperm.xlu0 %1986, %v2290_v2  }
  0x60   :  { %1715 = vmatpush3.bf16.msra.mxu0 %v2331_v27  ;;  %1736 = vmatpush3.bf16.msra.mxu1 %v2331_v27 }
  0x61   :  { %1716 = vmatprep.subr.bf16.mxu0 %v2159_v10  ;;  %1737 = vmatprep.subr.bf16.mxu1 %v2159_v10 }
  0x63   :  { %1984 = vset.pattern.permute.xlu1 %v2168_v28  ;;  %1989 = vset.pattern.permute.xlu0 %v2169_v29  ;;  %v2205_v28 = vmov 46  }
  0x64   :  { %254 = vperm.xlu1 %1984, %v2290_v2   ;;  %360 = vperm.xlu0 %1989, %v2290_v2  }
  0x65   :  { %1718 = vmatpush3.bf16.msra.mxu0 %v2339_v32  ;;  %1739 = vmatpush3.bf16.msra.mxu1 %v2339_v32 }
  0x66   :  { %1719 = vmatprep.subr.bf16.mxu0 %v2159_v10  ;;  %1740 = vmatprep.subr.bf16.mxu1 %v2159_v10 }
  0x68   :  { %1985 = vset.pattern.permute.xlu1 %v2170_v33  ;;  %1992 = vset.pattern.permute.xlu0 %v2171_v34 }
  0x69   :  { %259 = vperm.xlu1 %1985, %v2290_v2   ;;  %466 = vperm.xlu0 %1992, %v2290_v2  }
  0x6a   :  { %1721 = vmatpush3.bf16.msra.mxu0 %v2347_v37  ;;  %1742 = vmatpush3.bf16.msra.mxu1 %v2347_v37 }
  0x6b   :  { %1743 = vmatprep.subr.bf16.mxu0 %v2159_v10  ;;  %1764 = vmatprep.subr.bf16.mxu1 %v2159_v10 }
  0x6d   :  { %1987 = vset.pattern.permute.xlu1 %v2172_v38  ;;  %1995 = vset.pattern.permute.xlu0 %v2173_v39 }
  0x6e   :  { %351 = vperm.xlu1 %1987, %v2290_v2   ;;  %375 = vperm.xlu0 %1995, %v2290_v2  }
  0x72   :  { %1988 = vset.pattern.permute.xlu1 %v2174_v40  ;;  %1998 = vset.pattern.permute.xlu0 %v2175_v41 }
  0x73   :  { %355 = vperm.xlu1 %1988, %v2290_v2   ;;  %486 = vperm.xlu0 %1998, %v2290_v2  }
  0x77   :  { %1990 = vset.pattern.permute.xlu1 %v2176_v42  ;;  %2001 = vset.pattern.permute.xlu0 %v2177_v43 }
  0x78   :  { %365 = vperm.xlu1 %1990, %v2290_v2   ;;  %582 = vperm.xlu0 %2001, %v2290_v2  }
  0x7c   :  { %1991 = vset.pattern.permute.xlu1 %v2178_v44  ;;  %2004 = vset.pattern.permute.xlu0 %v2179_v45 }
  0x7d   :  { %462 = vperm.xlu1 %1991, %v2290_v2   ;;  %688 = vperm.xlu0 %2004, %v2290_v2  }
  0x81   :  { %1993 = vset.pattern.permute.xlu1 %v2180_v46  ;;  %2007 = vset.pattern.permute.xlu0 %v2181_v47 }
  0x82   :  { %370 = vperm.xlu1 %1993, %v2290_v2   ;;  %597 = vperm.xlu0 %2007, %v2290_v2  }
  0x86   :  { %1994 = vset.pattern.permute.xlu1 %v2182_v48  ;;  %2010 = vset.pattern.permute.xlu0 %v2183_v49 }
  0x87   :  { %471 = vperm.xlu1 %1994, %v2290_v2   ;;  %708 = vperm.xlu0 %2010, %v2290_v2  }
  0x8b   :  { %1996 = vset.pattern.permute.xlu1 %v2184_v50  ;;  %2013 = vset.pattern.permute.xlu0 %v2185_v51 }
  0x8c   :  { %476 = vperm.xlu1 %1996, %v2290_v2   ;;  %804 = vperm.xlu0 %2013, %v2290_v2  }
  0x90   :  { %1997 = vset.pattern.permute.xlu1 %v2186_v52  ;;  %2016 = vset.pattern.permute.xlu0 %v2187_v53 }
  0x91   :  { %481 = vperm.xlu1 %1997, %v2290_v2   ;;  %910 = vperm.xlu0 %2016, %v2290_v2  }
  0x95   :  { %1999 = vset.pattern.permute.xlu1 %v2188_v54  ;;  %2019 = vset.pattern.permute.xlu0 %v2189_v55 }
  0x96   :  { %573 = vperm.xlu1 %1999, %v2290_v2   ;;  %819 = vperm.xlu0 %2019, %v2290_v2  }
  0x9a   :  { %2000 = vset.pattern.permute.xlu1 %v2190_v56  ;;  %2022 = vset.pattern.permute.xlu0 %v2191_v57 }
  0x9b   :  { %577 = vperm.xlu1 %2000, %v2290_v2   ;;  %930 = vperm.xlu0 %2022, %v2290_v2  }
  0x9f   :  { %2002 = vset.pattern.permute.xlu1 %v2192_v58 }
  0xa0   :  { %587 = vperm.xlu1 %2002, %v2290_v2  }
  0xa4   :  { %2003 = vset.pattern.permute.xlu1 %v2193_v59 }
  0xa5   :  { %684 = vperm.xlu1 %2003, %v2290_v2  }
  0xa9   :  { %2005 = vset.pattern.permute.xlu1 %v2194_v60 }
  0xaa   :  { %592 = vperm.xlu1 %2005, %v2290_v2  }
  0xae   :  { %2006 = vset.pattern.permute.xlu1 %v2195_v61 }
  0xaf   :  { %693 = vperm.xlu1 %2006, %v2290_v2  }
  0xb3   :  { %2008 = vset.pattern.permute.xlu1 %v2196_v62 }
  0xb4   :  { %698 = vperm.xlu1 %2008, %v2290_v2  }
  0xb8   :  { %2009 = vset.pattern.permute.xlu1 %v2197_v63 }
  0xb9   :  { %703 = vperm.xlu1 %2009, %v2290_v2  }
  0xbd   :  { %2011 = vset.pattern.permute.xlu1 %v2198_v0 }
  0xbe   :  { %795 = vperm.xlu1 %2011, %v2290_v2  }
  0xc2   :  { %2012 = vset.pattern.permute.xlu1 %v2199_v3 }
  0xc3   :  { %799 = vperm.xlu1 %2012, %v2290_v2  }
  0xc7   :  { %2014 = vset.pattern.permute.xlu1 %v2200_v4 }
  0xc8   :  { %809 = vperm.xlu1 %2014, %v2290_v2  }
  0xca   :  { %v134_v6 = vpop.permute.xlu1 %133  ;;  %v125_v7 = vpop.permute.xlu0 %124 }
  0xcb   :  { %vm126_vm1 = vcmp.eq.s32.totalorder %v2385_v12, %v125_v7  ;;  %vm135_vm4 = vcmp.eq.s32.totalorder %v2385_v12, %v134_v6 }
  0xcc   :  { %2015 = vset.pattern.permute.xlu1 %v2201_v9  ;;  %v86_v9 = vld [vmem:[#allocation7] sm:$0xff] }
  0xcd   :  { %906 = vperm.xlu1 %2015, %v2290_v2  }
  0xcf   :  { %v139_v13 = vpop.permute.xlu1 %138  ;;  %v129_v14 = vpop.permute.xlu0 %128 }
  0xd0   :  { %vm130_vm2 = vcmp.eq.s32.totalorder %v2385_v12, %v129_v14  ;;  %vm140_vm6 = vcmp.eq.s32.totalorder %v2385_v12, %v139_v13  ;;  %v87_v13 = vld [vmem:[#allocation7 + $0x8] sm:$0xff]  ;;  %v88_v14 = vld [vmem:[#allocation7 + $0x10] sm:$0xff] }
  0xd1   :  { %2017 = vset.pattern.permute.xlu1 %v2202_v15  ;;  %vm131_vm3 = vmor %vm126_vm1, %vm130_vm2  ;;  %v1870_v15 = vpack.c.bf16 %v87_v13, %v86_v9 }
  0xd2   :  { %814 = vperm.xlu1 %2017, %v2290_v2   ;;  %vm136_vm5 = vmor %vm131_vm3, %vm135_vm4 }
  0xd3   :  { %vm141_vm7 = vmor %vm136_vm5, %vm140_vm6 }
  0xd4   :  { %v241_v17 = vpop.permute.xlu1 %240  ;;  %v245_v18 = vpop.permute.xlu0 %244 }
  0xd5   :  { %vm242_vm13 = vcmp.eq.s32.totalorder %v2385_v12, %v241_v17  ;;  %vm246_vm14 = vcmp.eq.s32.totalorder %v2385_v12, %v245_v18  ;;  %v89_v17 = vld [vmem:[#allocation7 + $0x18] sm:$0xff] }
  0xd6   :  { %2018 = vset.pattern.permute.xlu1 %v2203_v19  ;;  %vm247_vm2 = vmor %vm242_vm13, %vm246_vm14  ;;  %v1873_v18 = vpack.c.bf16 %v89_v17, %v88_v14  ;;  %v90_v19 = vld [vmem:[#allocation7 + $0x20] sm:$0xff] }
  0xd7   :  { %915 = vperm.xlu1 %2018, %v2290_v2  }
  0xd9   :  { %v144_v20 = vpop.permute.xlu1 %143  ;;  %v149_v23 = vpop.permute.xlu0 %148 }
  0xda   :  { %vm145_vm8 = vcmp.eq.s32.totalorder %v2385_v12, %v144_v20  ;;  %vm150_vm9 = vcmp.eq.s32.totalorder %v2385_v12, %v149_v23  ;;  %v91_v20 = vld [vmem:[#allocation7 + $0x28] sm:$0xff] }
  0xdb   :  { %vm146_vm10 = vmor %vm141_vm7, %vm145_vm8  ;;  %2020 = vset.pattern.permute.xlu1 %v2204_v24  ;;  %v1876_v23 = vpack.c.bf16 %v91_v20, %v90_v19  ;;  %v2561_v24 = vld [vmem:[#allocation8] sm:$0xff] }
  0xdc   :  { %vm151_vm12 = vmor %vm146_vm10, %vm150_vm9  ;;  %920 = vperm.xlu1 %2020, %v2290_v2  }
  0xdd   :  { %v1212_v25 = vsel %vm151_vm12, 1.0, %v2165_v22 }
  0xde   :  { %v250_v26 = vpop.permute.xlu1 %249  ;;  %1412 = vmatmul.mubr.msk.f32.vlgmr.msra.gmra.mrb[0].mxu0 %vm158_vm11, %v1212_v25  ;;  %v265_v30 = vpop.permute.xlu0 %264  ;;  %v92_v25 = vld [vmem:[#allocation7 + $0x30] sm:$0xff] }
  0xdf   :  { %1745 = vmatpush3.bf16.msra.mxu0 %v2294_v5  ;;  %1473 = vmatprep.mubr.msk.f32.mxu0 %vm2164_vm0, %v2165_v22  ;;  %vm251_vm15 = vcmp.eq.s32.totalorder %v2385_v12, %v250_v26  ;;  %vm266_vm4 = vcmp.eq.s32.totalorder %v2385_v12, %v265_v30  ;;  %v93_v26 = vld [vmem:[#allocation7 + $0x38] sm:$0xff]  ;;  %v2567_v30 = vld [vmem:[#allocation8 + $0x8] sm:$0xff] }
  0xe0   :  { %2021 = vset.pattern.permute.xlu1 %v2205_v28  ;;  %1746 = vmatprep.subr.bf16.mxu0 %v2159_v10  ;;  %vm252_vm3 = vmor %vm247_vm2, %vm251_vm15  ;;  %v1879_v28 = vpack.c.bf16 %v93_v26, %v92_v25 }
  0xe1   :  { %925 = vperm.xlu1 %2021, %v2290_v2  }
  0xe3   :  { %v255_v29 = vpop.permute.xlu1 %254  ;;  %1748 = vmatpush3.bf16.msra.mxu0 %v2301_v11  ;;  %v361_v35 = vpop.permute.xlu0 %360 }
  0xe4   :  { %1749 = vmatprep.subr.bf16.mxu0 %v2159_v10  ;;  %vm256_vm1 = vcmp.eq.s32.totalorder %v2385_v12, %v255_v29  ;;  %vm362_vm13 = vcmp.eq.s32.totalorder %v2385_v12, %v361_v35 }
  0xe5   :  { %vm257_vm5 = vmor %vm252_vm3, %vm256_vm1 }
  0xe7   :  { %1751 = vmatpush3.bf16.msra.mxu0 %v2311_v16 }
  0xe8   :  { %v260_v31 = vpop.permute.xlu1 %259  ;;  %1752 = vmatprep.subr.bf16.mxu0 %v2159_v10  ;;  %v467_v38 = vpop.permute.xlu0 %466 }
  0xe9   :  { %vm261_vm6 = vcmp.eq.s32.totalorder %v2385_v12, %v260_v31  ;;  %v95_v31 = vld [vmem:[#allocation7 + $0x48] sm:$0xff] }
  0xea   :  { %vm262_vm7 = vmor %vm257_vm5, %vm261_vm6 }
  0xeb   :  { %vm267_vm8 = vmor %vm262_vm7, %vm266_vm4  ;;  %1754 = vmatpush3.bf16.msra.mxu0 %v2319_v21  ;;  %vm468_vm7 = vcmp.eq.s32.totalorder %v2385_v12, %v467_v38 }
  0xec   :  { %v1214_v2 = vsel %vm267_vm8, 1.0, %v2165_v22  ;;  %1755 = vmatprep.subr.bf16.mxu0 %v2159_v10 }
  0xed   :  { %v352_v33 = vpop.permute.xlu1 %351  ;;  %1443 = vmatmul.mubr.msk.f32.vlgmr.msra.gmra.mrb[0].mxu1 %vm158_vm11, %v1214_v2  ;;  %v376_v40 = vpop.permute.xlu0 %375 }
  0xee   :  { %1766 = vmatpush3.bf16.msra.mxu1 %v2294_v5  ;;  %1504 = vmatprep.mubr.msk.f32.mxu1 %vm2164_vm0, %v2165_v22  ;;  %vm353_vm10 = vcmp.eq.s32.totalorder %v2385_v12, %v352_v33  ;;  %vm377_vm1 = vcmp.eq.s32.totalorder %v2385_v12, %v376_v40  ;;  %v96_v33 = vld [vmem:[#allocation7 + $0x50] sm:$0xff] }
  0xef   :  { %1757 = vmatpush3.bf16.msra.mxu0 %v2331_v27  ;;  %1767 = vmatprep.subr.bf16.mxu1 %v2159_v10 }
  0xf0   :  { %1758 = vmatprep.subr.bf16.mxu0 %v2159_v10 }
  0xf2   :  { %v356_v34 = vpop.permute.xlu1 %355  ;;  %1769 = vmatpush3.bf16.msra.mxu1 %v2301_v11  ;;  %v487_v45 = vpop.permute.xlu0 %486 }
  0xf3   :  { %1760 = vmatpush3.bf16.msra.mxu0 %v2339_v32  ;;  %1770 = vmatprep.subr.bf16.mxu1 %v2159_v10  ;;  %vm357_vm9 = vcmp.eq.s32.totalorder %v2385_v12, %v356_v34  ;;  %v97_v34 = vld [vmem:[#allocation7 + $0x58] sm:$0xff] }
  0xf4   :  { %1761 = vmatprep.subr.bf16.mxu0 %v2159_v10  ;;  %vm358_vm12 = vmor %vm353_vm10, %vm357_vm9  ;;  %v1885_v40 = vpack.c.bf16 %v97_v34, %v96_v33 }
  0xf5   :  { %vm363_vm15 = vmor %vm358_vm12, %vm362_vm13  ;;  %vm488_vm13 = vcmp.eq.s32.totalorder %v2385_v12, %v487_v45 }
  0xf6   :  { %1772 = vmatpush3.bf16.msra.mxu1 %v2311_v16 }
  0xf7   :  { %v366_v36 = vpop.permute.xlu1 %365  ;;  %1763 = vmatpush3.bf16.msra.mxu0 %v2347_v37  ;;  %1773 = vmatprep.subr.bf16.mxu1 %v2159_v10  ;;  %v583_v50 = vpop.permute.xlu0 %582 }
  0xf8   :  { %1785 = vmatprep.subr.bf16.mxu0 %v2159_v10  ;;  %vm367_vm14 = vcmp.eq.s32.totalorder %v2385_v12, %v366_v36 }
  0xf9   :  { %vm368_vm2 = vmor %vm363_vm15, %vm367_vm14 }
  0xfa   :  { %1775 = vmatpush3.bf16.msra.mxu1 %v2319_v21 }
  0xfb   :  { %1776 = vmatprep.subr.bf16.mxu1 %v2159_v10 }
  0xfc   :  { %v463_v39 = vpop.permute.xlu1 %462  ;;  %v689_v52 = vpop.permute.xlu0 %688 }
  0xfd   :  { %vm464_vm6 = vcmp.eq.s32.totalorder %v2385_v12, %v463_v39 }
  0xfe   :  { %1778 = vmatpush3.bf16.msra.mxu1 %v2331_v27  ;;  %vm469_vm10 = vmor %vm464_vm6, %vm468_vm7  ;;  %vm584_vm6 = vcmp.eq.s32.totalorder %v2385_v12, %v583_v50 }
  0xff   :  { %1779 = vmatprep.subr.bf16.mxu1 %v2159_v10 }
 0x101   :  { %v371_v41 = vpop.permute.xlu1 %370  ;;  %v598_v54 = vpop.permute.xlu0 %597 }
 0x102   :  { %vm372_vm3 = vcmp.eq.s32.totalorder %v2385_v12, %v371_v41  ;;  %1781 = vmatpush3.bf16.msra.mxu1 %v2339_v32 }
 0x103   :  { %vm373_vm4 = vmor %vm368_vm2, %vm372_vm3  ;;  %1782 = vmatprep.subr.bf16.mxu1 %v2159_v10 }
 0x104   :  { %vm378_vm5 = vmor %vm373_vm4, %vm377_vm1 }
 0x105   :  { %v1216_v42 = vsel %vm378_vm5, 1.0, %v2165_v22 }
 0x106   :  { %v472_v43 = vpop.permute.xlu1 %471  ;;  %1474 = vmatmul.mubr.msk.f32.vlgmr.msra.gmra.mrb[2].mxu0 %vm158_vm11, %v1216_v42  ;;  %1784 = vmatpush3.bf16.msra.mxu1 %v2347_v37  ;;  %v709_v59 = vpop.permute.xlu0 %708 }
 0x107   :  { %1787 = vmatpush3.bf16.msra.mxu0 %v2294_v5  ;;  %1806 = vmatprep.subr.bf16.mxu1 %v2159_v10  ;;  %vm473_vm8 = vcmp.eq.s32.totalorder %v2385_v12, %v472_v43  ;;  %v98_v43 = vld [vmem:[#allocation7 + $0x60] sm:$0xff] }
 0x108   :  { %1788 = vmatprep.subr.bf16.mxu0 %v2159_v10  ;;  %1535 = vmatprep.mubr.msk.f32.mxu0 %vm2164_vm0, %v2165_v22  ;;  %vm474_vm12 = vmor %vm469_vm10, %vm473_vm8 }
 0x10b   :  { %v477_v44 = vpop.permute.xlu1 %476  ;;  %1790 = vmatpush3.bf16.msra.mxu0 %v2301_v11  ;;  %v805_v0 = vpop.permute.xlu0 %804 }
 0x10c   :  { %1791 = vmatprep.subr.bf16.mxu0 %v2159_v10  ;;  %vm478_vm9 = vcmp.eq.s32.totalorder %v2385_v12, %v477_v44  ;;  %v99_v44 = vld [vmem:[#allocation7 + $0x68] sm:$0xff] }
 0x10d   :  { %vm479_vm14 = vmor %vm474_vm12, %vm478_vm9  ;;  %vm599_vm9 = vcmp.eq.s32.totalorder %v2385_v12, %v598_v54  ;;  %v1888_v45 = vpack.c.bf16 %v99_v44, %v98_v43 }
 0x10f   :  { %1793 = vmatpush3.bf16.msra.mxu0 %v2311_v16 }
 0x110   :  { %v482_v46 = vpop.permute.xlu1 %481  ;;  %1794 = vmatprep.subr.bf16.mxu0 %v2159_v10  ;;  %v911_v3 = vpop.permute.xlu0 %910 }
 0x111   :  { %vm483_vm15 = vcmp.eq.s32.totalorder %v2385_v12, %v482_v46  ;;  %v100_v46 = vld [vmem:[#allocation7 + $0x70] sm:$0xff] }
 0x112   :  { %vm484_vm1 = vmor %vm479_vm14, %vm483_vm15 }
 0x113   :  { %vm489_vm2 = vmor %vm484_vm1, %vm488_vm13  ;;  %1796 = vmatpush3.bf16.msra.mxu0 %v2319_v21  ;;  %vm690_vm1 = vcmp.eq.s32.totalorder %v2385_v12, %v689_v52 }
 0x114   :  { %v1218_v47 = vsel %vm489_vm2, 1.0, %v2165_v22  ;;  %1797 = vmatprep.subr.bf16.mxu0 %v2159_v10 }
 0x115   :  { %v574_v48 = vpop.permute.xlu1 %573  ;;  %1505 = vmatmul.mubr.msk.f32.vlgmr.msra.gmra.mrb[2].mxu1 %vm158_vm11, %v1218_v47  ;;  %v101_v47 = vld [vmem:[#allocation7 + $0x78] sm:$0xff] }
 0x116   :  { %1808 = vmatpush3.bf16.msra.mxu1 %v2294_v5  ;;  %1566 = vmatprep.mubr.msk.f32.mxu1 %vm2164_vm0, %v2165_v22  ;;  %vm575_vm4 = vcmp.eq.s32.totalorder %v2385_v12, %v574_v48  ;;  %v1891_v48 = vpack.c.bf16 %v101_v47, %v100_v46 }
 0x117   :  { %1799 = vmatpush3.bf16.msra.mxu0 %v2331_v27  ;;  %1809 = vmatprep.subr.bf16.mxu1 %v2159_v10 }
 0x118   :  { %1800 = vmatprep.subr.bf16.mxu0 %v2159_v10 }
 0x11a   :  { %v578_v49 = vpop.permute.xlu1 %577  ;;  %1811 = vmatpush3.bf16.msra.mxu1 %v2301_v11 }
 0x11b   :  { %1802 = vmatpush3.bf16.msra.mxu0 %v2339_v32  ;;  %1812 = vmatprep.subr.bf16.mxu1 %v2159_v10  ;;  %vm579_vm3 = vcmp.eq.s32.totalorder %v2385_v12, %v578_v49 }
 0x11c   :  { %1803 = vmatprep.subr.bf16.mxu0 %v2159_v10  ;;  %vm580_vm5 = vmor %vm575_vm4, %vm579_vm3 }
 0x11d   :  { %vm585_vm8 = vmor %vm580_vm5, %vm584_vm6  ;;  %vm710_vm6 = vcmp.eq.s32.totalorder %v2385_v12, %v709_v59 }
 0x11e   :  { %1814 = vmatpush3.bf16.msra.mxu1 %v2311_v16 }
 0x11f   :  { %v588_v51 = vpop.permute.xlu1 %587  ;;  %1805 = vmatpush3.bf16.msra.mxu0 %v2347_v37  ;;  %1815 = vmatprep.subr.bf16.mxu1 %v2159_v10 }
 0x120   :  { %1827 = vmatprep.subr.bf16.mxu0 %v2159_v10  ;;  %vm589_vm7 = vcmp.eq.s32.totalorder %v2385_v12, %v588_v51 }
 0x121   :  { %vm590_vm10 = vmor %vm585_vm8, %vm589_vm7 }
 0x122   :  { %1817 = vmatpush3.bf16.msra.mxu1 %v2319_v21 }
 0x123   :  { %1818 = vmatprep.subr.bf16.mxu1 %v2159_v10 }
 0x124   :  { %v685_v53 = vpop.permute.xlu1 %684 }
 0x125   :  { %vm686_vm15 = vcmp.eq.s32.totalorder %v2385_v12, %v685_v53 }
 0x126   :  { %1820 = vmatpush3.bf16.msra.mxu1 %v2331_v27  ;;  %vm691_vm4 = vmor %vm686_vm15, %vm690_vm1  ;;  %vm806_vm15 = vcmp.eq.s32.totalorder %v2385_v12, %v805_v0 }
 0x127   :  { %1821 = vmatprep.subr.bf16.mxu1 %v2159_v10 }
 0x129   :  { %v593_v55 = vpop.permute.xlu1 %592 }
 0x12a   :  { %vm594_vm12 = vcmp.eq.s32.totalorder %v2385_v12, %v593_v55  ;;  %1823 = vmatpush3.bf16.msra.mxu1 %v2339_v32 }
 0x12b   :  { %vm595_vm13 = vmor %vm590_vm10, %vm594_vm12  ;;  %1824 = vmatprep.subr.bf16.mxu1 %v2159_v10 }
 0x12c   :  { %vm600_vm14 = vmor %vm595_vm13, %vm599_vm9 }
 0x12d   :  { %v1220_v56 = vsel %vm600_vm14, 1.0, %v2165_v22 }
 0x12e   :  { %v694_v57 = vpop.permute.xlu1 %693  ;;  %1536 = vmatmul.mubr.msk.f32.vlgmr.msra.gmra.mrb[4].mxu0 %vm158_vm11, %v1220_v56  ;;  %1826 = vmatpush3.bf16.msra.mxu1 %v2347_v37 }
 0x12f   :  { %1829 = vmatpush3.bf16.msra.mxu0 %v2294_v5  ;;  %1848 = vmatprep.subr.bf16.mxu1 %v2159_v10  ;;  %vm695_vm2 = vcmp.eq.s32.totalorder %v2385_v12, %v694_v57 }
 0x130   :  { %1830 = vmatprep.subr.bf16.mxu0 %v2159_v10  ;;  %1597 = vmatprep.mubr.msk.f32.mxu0 %vm2164_vm0, %v2165_v22  ;;  %vm696_vm5 = vmor %vm691_vm4, %vm695_vm2 }
 0x133   :  { %v699_v58 = vpop.permute.xlu1 %698  ;;  %1832 = vmatpush3.bf16.msra.mxu0 %v2301_v11 }
 0x134   :  { %1833 = vmatprep.subr.bf16.mxu0 %v2159_v10  ;;  %vm700_vm3 = vcmp.eq.s32.totalorder %v2385_v12, %v699_v58 }
 0x135   :  { %vm701_vm7 = vmor %vm696_vm5, %vm700_vm3 }
 0x137   :  { %1835 = vmatpush3.bf16.msra.mxu0 %v2311_v16 }
 0x138   :  { %v704_v60 = vpop.permute.xlu1 %703  ;;  %1836 = vmatprep.subr.bf16.mxu0 %v2159_v10 }
 0x139   :  { %vm705_vm8 = vcmp.eq.s32.totalorder %v2385_v12, %v704_v60 }
 0x13a   :  { %vm706_vm9 = vmor %vm701_vm7, %vm705_vm8 }
 0x13b   :  { %vm711_vm10 = vmor %vm706_vm9, %vm710_vm6  ;;  %1838 = vmatpush3.bf16.msra.mxu0 %v2319_v21  ;;  %vm912_vm9 = vcmp.eq.s32.totalorder %v2385_v12, %v911_v3 }
 0x13c   :  { %v1222_v61 = vsel %vm711_vm10, 1.0, %v2165_v22  ;;  %1839 = vmatprep.subr.bf16.mxu0 %v2159_v10 }
 0x13d   :  { %v796_v62 = vpop.permute.xlu1 %795  ;;  %1567 = vmatmul.mubr.msk.f32.vlgmr.msra.gmra.mrb[4].mxu1 %vm158_vm11, %v1222_v61 }
 0x13e   :  { %1850 = vmatpush3.bf16.msra.mxu1 %v2294_v5  ;;  %1628 = vmatprep.mubr.msk.f32.mxu1 %vm2164_vm0, %v2165_v22  ;;  %vm797_vm13 = vcmp.eq.s32.totalorder %v2385_v12, %v796_v62 }
 0x13f   :  { %1841 = vmatpush3.bf16.msra.mxu0 %v2331_v27  ;;  %1851 = vmatprep.subr.bf16.mxu1 %v2159_v10 }
 0x140   :  { %1842 = vmatprep.subr.bf16.mxu0 %v2159_v10 }
 0x142   :  { %v800_v63 = vpop.permute.xlu1 %799  ;;  %1853 = vmatpush3.bf16.msra.mxu1 %v2301_v11 }
 0x143   :  { %1844 = vmatpush3.bf16.msra.mxu0 %v2339_v32  ;;  %1854 = vmatprep.subr.bf16.mxu1 %v2159_v10  ;;  %vm801_vm12 = vcmp.eq.s32.totalorder %v2385_v12, %v800_v63 }
 0x144   :  { %1845 = vmatprep.subr.bf16.mxu0 %v2159_v10  ;;  %vm802_vm14 = vmor %vm797_vm13, %vm801_vm12 }
 0x145   :  { %vm807_vm2 = vmor %vm802_vm14, %vm806_vm15 }
 0x146   :  { %1856 = vmatpush3.bf16.msra.mxu1 %v2311_v16  ;;  %v820_v16 = vpop.permute.xlu0 %819 }
 0x147   :  { %v810_v5 = vpop.permute.xlu1 %809  ;;  %1847 = vmatpush3.bf16.msra.mxu0 %v2347_v37  ;;  %1857 = vmatprep.subr.bf16.mxu1 %v2159_v10  ;;  %vm821_vm3 = vcmp.eq.s32.totalorder %v2385_v12, %v820_v16 }
 0x148   :  { %1869 = vmatprep.subr.bf16.mxu0 %v2159_v10  ;;  %vm811_vm1 = vcmp.eq.s32.totalorder %v2385_v12, %v810_v5 }
 0x149   :  { %vm812_vm4 = vmor %vm807_vm2, %vm811_vm1 }
 0x14a   :  { %1859 = vmatpush3.bf16.msra.mxu1 %v2319_v21 }
 0x14b   :  { %1860 = vmatprep.subr.bf16.mxu1 %v2159_v10 }
 0x14c   :  { %v907_v11 = vpop.permute.xlu1 %906 }
 0x14d   :  { %vm908_vm8 = vcmp.eq.s32.totalorder %v2385_v12, %v907_v11 }
 0x14e   :  { %1862 = vmatpush3.bf16.msra.mxu1 %v2331_v27  ;;  %vm913_vm13 = vmor %vm908_vm8, %vm912_vm9 }
 0x14f   :  { %1863 = vmatprep.subr.bf16.mxu1 %v2159_v10 }
 0x151   :  { %v815_v4 = vpop.permute.xlu1 %814 }
 0x152   :  { %vm816_vm5 = vcmp.eq.s32.totalorder %v2385_v12, %v815_v4  ;;  %1865 = vmatpush3.bf16.msra.mxu1 %v2339_v32  ;;  %v931_v32 = vpop.permute.xlu0 %930 }
 0x153   :  { %vm817_vm6 = vmor %vm812_vm4, %vm816_vm5  ;;  %1866 = vmatprep.subr.bf16.mxu1 %v2159_v10  ;;  %vm932_vm15 = vcmp.eq.s32.totalorder %v2385_v12, %v931_v32 }
 0x154   :  { %vm822_vm7 = vmor %vm817_vm6, %vm821_vm3 }
 0x155   :  { %v1224_v21 = vsel %vm822_vm7, 1.0, %v2165_v22 }
 0x156   :  { %v916_v27 = vpop.permute.xlu1 %915  ;;  %1598 = vmatmul.mubr.msk.f32.vlgmr.msra.gmra.mrb[6].mxu0 %vm158_vm11, %v1224_v21  ;;  %1868 = vmatpush3.bf16.msra.mxu1 %v2347_v37 }
 0x157   :  { %1663 = vmatprep.mubr.msk.f32.mxu0 %vm2164_vm0, %v2165_v22  ;;  %1893 = vmatprep.subr.bf16.mxu1 %v2159_v10  ;;  %vm917_vm10 = vcmp.eq.s32.totalorder %v2385_v12, %v916_v27 }
 0x158   :  { %vm918_vm14 = vmor %vm913_vm13, %vm917_vm10  ;;  %1871 = vmatpush3.bf16.msra.mxu0 %v1870_v15 }
 0x159   :  { %1872 = vmatprep.subr.bf16.mxu0 %v2159_v10 }
 0x15b   :  { %v921_v6 = vpop.permute.xlu1 %920 }
 0x15c   :  { %vm922_vm12 = vcmp.eq.s32.totalorder %v2385_v12, %v921_v6  ;;  %1874 = vmatpush3.bf16.msra.mxu0 %v1873_v18 }
 0x15d   :  { %vm923_vm1 = vmor %vm918_vm14, %vm922_vm12  ;;  %1875 = vmatprep.subr.bf16.mxu0 %v2159_v10 }
 0x160   :  { %v926_v7 = vpop.permute.xlu1 %925  ;;  %1877 = vmatpush3.bf16.msra.mxu0 %v1876_v23 }
 0x161   :  { %vm927_vm2 = vcmp.eq.s32.totalorder %v2385_v12, %v926_v7  ;;  %v2558_v12 = vshrl.u32 %v121_v8, 7  ;;  %1878 = vmatprep.subr.bf16.mxu0 %v2159_v10  ;;  %v94_v8 = vld [vmem:[#allocation7 + $0x40] sm:$0xff] }
 0x162   :  { %vm928_vm3 = vmor %vm923_vm1, %vm927_vm2  ;;  %v1882_v2 = vpack.c.bf16 %v95_v31, %v94_v8 }
 0x163   :  { %vm933_vm4 = vmor %vm928_vm3, %vm932_vm15  ;;  %v346_v49 = vsub.s32 1, %v2558_v12  ;;  %v457_v58 = vsub.s32 2, %v2558_v12  ;;  %v568_v3 = vsub.s32 3, %v2558_v12  ;;  %v679_v7 = vsub.s32 4, %v2558_v12 }
 0x164   :  { %v1226_v37 = vsel %vm933_vm4, 1.0, %v2165_v22  ;;  %1880 = vmatpush3.bf16.msra.mxu0 %v1879_v28  ;;  %v790_v19 = vsub.s32 5, %v2558_v12  ;;  %v901_v31 = vsub.s32 6, %v2558_v12 }
 0x165   :  { %1629 = vmatmul.mubr.msk.f32.vlgmr.msra.gmra.mrb[6].mxu1 %vm158_vm11, %v1226_v37  ;;  %1881 = vmatprep.subr.bf16.mxu0 %v2159_v10  ;;  %v347_v52 = vrot.slane %v2567_v30, %v346_v49  ;;  %v458_v61 = vrot.slane %v2567_v30, %v457_v58  ;;  %v569_v4 = vrot.slane %v2567_v30, %v568_v3 }
 0x166   :  { %1698 = vmatprep.mubr.msk.f32.mxu1 %vm2164_vm0, %v2165_v22  ;;  %v156_v22 = vsub.s32 0, %v2558_v12  ;;  %v680_v13 = vrot.slane %v2567_v30, %v679_v7  ;;  %v902_v34 = vrot.slane %v2567_v30, %v901_v31  ;;  %vm1175_vm0 = vcmp.gt.f32.partialorder %v2561_v24, 0.5 }
 0x168   :  { %v2565_v29 = vrot.slane %v2561_v24, %v156_v22  ;;  %v236_v38 = vrot.slane %v2567_v30, %v156_v22  ;;  %1883 = vmatpush3.bf16.msra.mxu0 %v1882_v2  ;;  %v791_v22 = vrot.slane %v2567_v30, %v790_v19 }
 0x169   :  { %1884 = vmatprep.subr.bf16.mxu0 %v2159_v10 }
 0x16c   :  { %1886 = vmatpush3.bf16.msra.mxu0 %v1885_v40  ;;  %v1012_v40 = vsub.s32 7, %v2558_v12 }
 0x16d   :  { %1887 = vmatprep.subr.bf16.mxu0 %v2159_v10 }
 0x16e   :  { %v1013_v43 = vrot.slane %v2567_v30, %v1012_v40 }
 0x170   :  { %1889 = vmatpush3.bf16.msra.mxu0 %v1888_v45 }
 0x171   :  { %1890 = vmatprep.subr.bf16.mxu0 %v2159_v10 }
 0x174   :  { %1892 = vmatpush3.bf16.msra.mxu0 %v1891_v48  ;;  %v103_v48 = vld [vmem:[#allocation7 + $0x80] sm:$0xff] }
 0x1b1   :  { %v228_v35 = vpop.f32.mrb[0].mxu0 }
 0x1b2   :  { %v229_v36 = vadd.f32 %v228_v35, %v2565_v29  ;;  %v1413_v39 = vpop.f32.mrb[1].mxu0 }
 0x1b4   :  { %v232_v41 = vmax.f32 %v229_v36, 0.0 }
 0x1b6   :  { %v237_v42 = vmul.f32 %v236_v38, %v232_v41 }
 0x1b8   :  { %v238_v55 = vmax.f32 %v237_v42, 0.0 }
 0x1c0   :  { %v339_v50 = vpop.f32.mrb[0].mxu1 }
 0x1c1   :  { %v340_v51 = vadd.f32 %v339_v50, %v2565_v29  ;;  %v1444_v53 = vpop.f32.mrb[1].mxu1  ;;  %v104_v50 = vld [vmem:[#allocation7 + $0x88] sm:$0xff] }
 0x1c2   :  { %v106_v53 = vld [vmem:[#allocation7 + $0x98] sm:$0xff] }
 0x1c3   :  { %v343_v54 = vmax.f32 %v340_v51, 0.0  ;;  %v1894_v51 = vpack.c.bf16 %v104_v50, %v103_v48 }
 0x1c5   :  { %v348_v56 = vmul.f32 %v347_v52, %v343_v54  ;;  %1895 = vmatpush3.bf16.msra.mxu1 %v1894_v51  ;;  %v105_v52 = vld [vmem:[#allocation7 + $0x90] sm:$0xff] }
 0x1c6   :  { %1896 = vmatprep.subr.bf16.mxu1 %v2159_v10  ;;  %v1897_v54 = vpack.c.bf16 %v106_v53, %v105_v52 }
 0x1c7   :  { %v349_v57 = vmax.f32 %v238_v55, %v348_v56  ;;  %v108_v55 = vld [vmem:[#allocation7 + $0xa8] sm:$0xff]  ;;  %v109_v56 = vld [vmem:[#allocation7 + $0xb0] sm:$0xff] }
 0x1c9   :  { %1898 = vmatpush3.bf16.msra.mxu1 %v1897_v54 }
 0x1ca   :  { %1899 = vmatprep.subr.bf16.mxu1 %v2159_v10 }
 0x1d9   :  { %v450_v59 = vpop.f32.mrb[2].mxu0 }
 0x1da   :  { %v451_v60 = vadd.f32 %v450_v59, %v2565_v29  ;;  %v1475_v62 = vpop.f32.mrb[3].mxu0 }
 0x1dc   :  { %v454_v63 = vmax.f32 %v451_v60, 0.0  ;;  %v111_v60 = vld [vmem:[#allocation7 + $0xc0] sm:$0xff] }
 0x1de   :  { %v459_v0 = vmul.f32 %v458_v61, %v454_v63  ;;  %v112_v61 = vld [vmem:[#allocation7 + $0xc8] sm:$0xff]  ;;  %v113_v63 = vld [vmem:[#allocation7 + $0xd0] sm:$0xff] }
 0x1df   :  { %v1906_v62 = vpack.c.bf16 %v112_v61, %v111_v60 }
 0x1e0   :  { %v460_v5 = vmax.f32 %v349_v57, %v459_v0  ;;  %v110_v57 = vld [vmem:[#allocation7 + $0xb8] sm:$0xff] }
 0x1e1   :  { %v1903_v59 = vpack.c.bf16 %v110_v57, %v109_v56  ;;  %v114_v0 = vld [vmem:[#allocation7 + $0xd8] sm:$0xff] }
 0x1e8   :  { %v561_v11 = vpop.f32.mrb[2].mxu1 }
 0x1e9   :  { %v562_v16 = vadd.f32 %v561_v11, %v2565_v29  ;;  %v1506_v21 = vpop.f32.mrb[3].mxu1  ;;  %v115_v11 = vld [vmem:[#allocation7 + $0xe0] sm:$0xff] }
 0x1ea   :  { %v117_v21 = vld [vmem:[#allocation7 + $0xf0] sm:$0xff] }
 0x1eb   :  { %v565_v27 = vmax.f32 %v562_v16, 0.0  ;;  %v116_v16 = vld [vmem:[#allocation7 + $0xe8] sm:$0xff] }
 0x1ed   :  { %v570_v6 = vmul.f32 %v569_v4, %v565_v27  ;;  %v1912_v4 = vpack.c.bf16 %v116_v16, %v115_v11  ;;  %v118_v27 = vld [vmem:[#allocation7 + $0xf8] sm:$0xff] }
 0x1ef   :  { %v571_v32 = vmax.f32 %v460_v5, %v570_v6  ;;  %v1909_v5 = vpack.c.bf16 %v114_v0, %v113_v63  ;;  %v1915_v6 = vpack.c.bf16 %v118_v27, %v117_v21 }
 0x201   :  { %v672_v37 = vpop.f32.mrb[4].mxu0 }
 0x202   :  { %v673_v9 = vadd.f32 %v672_v37, %v2565_v29  ;;  %v1537_v14 = vpop.f32.mrb[5].mxu0 }
 0x204   :  { %v676_v15 = vmax.f32 %v673_v9, 0.0 }
 0x206   :  { %v681_v17 = vmul.f32 %v680_v13, %v676_v15 }
 0x208   :  { %v682_v18 = vmax.f32 %v571_v32, %v681_v17  ;;  %v1019_v32 = vrot.slane %v2561_v24, %v346_v49 }
 0x210   :  { %v783_v20 = vpop.f32.mrb[4].mxu1 }
 0x211   :  { %v784_v23 = vadd.f32 %v783_v20, %v2565_v29  ;;  %v1568_v25 = vpop.f32.mrb[5].mxu1 }
 0x212   :  { %v1104_v25 = vrot.slane %v2561_v24, %v457_v58 }
 0x213   :  { %v787_v26 = vmax.f32 %v784_v23, 0.0 }
 0x215   :  { %v792_v28 = vmul.f32 %v791_v22, %v787_v26  ;;  %v1176_v22 = vsel %vm1175_vm0, 1, %v2156_v1 }
 0x216   :  { %v1180_v49 = vrot.slane %v1176_v22, %v568_v3 }
 0x217   :  { %v793_v8 = vmax.f32 %v682_v18, %v792_v28 }
 0x218   :  { %vm1181_vm11 = vcmp.eq.s32.totalorder %v1180_v49, 1 }
 0x229   :  { %v894_v2 = vpop.f32.mrb[6].mxu0 }
 0x22a   :  { %v895_v33 = vadd.f32 %v894_v2, %v2565_v29  ;;  %v1599_v35 = vpop.f32.mrb[7].mxu0 }
 0x22c   :  { %v898_v36 = vmax.f32 %v895_v33, 0.0 }
 0x22e   :  { %v903_v38 = vmul.f32 %v902_v34, %v898_v36 }
 0x230   :  { %v904_v39 = vmax.f32 %v793_v8, %v903_v38 }
 0x238   :  { %v1005_v41 = vpop.f32.mrb[6].mxu1 }
 0x239   :  { %v1006_v42 = vadd.f32 %v1005_v41, %v2565_v29  ;;  %v1630_v44 = vpop.f32.mrb[7].mxu1  ;;  %v107_v29 = vld [vmem:[#allocation7 + $0xa0] sm:$0xff] }
 0x23a   :  { %v1900_v30 = vpack.c.bf16 %v108_v55, %v107_v29 }
 0x23b   :  { %v1009_v45 = vmax.f32 %v1006_v42, 0.0 }
 0x23c   :  { %1901 = vmatpush3.bf16.msra.mxu1 %v1900_v30 }
 0x23d   :  { %v1014_v46 = vmul.f32 %v1013_v43, %v1009_v45  ;;  %1902 = vmatprep.subr.bf16.mxu1 %v2159_v10 }
 0x23f   :  { %v1015_v47 = vmax.f32 %v904_v39, %v1014_v46 }
 0x240   :  { %1904 = vmatpush3.bf16.msra.mxu1 %v1903_v59 }
 0x241   :  { %1664 = vmatmul.mubr.f32.vlgmr.msra.gmra.mrb[8].mxu0 %v1015_v47  ;;  %1905 = vmatprep.subr.bf16.mxu1 %v2159_v10 }
 0x244   :  { %1907 = vmatpush3.bf16.msra.mxu1 %v1906_v62 }
 0x245   :  { %1908 = vmatprep.subr.bf16.mxu1 %v2159_v10 }
 0x248   :  { %1910 = vmatpush3.bf16.msra.mxu1 %v1909_v5 }
 0x249   :  { %1911 = vmatprep.subr.bf16.mxu1 %v2159_v10 }
 0x24c   :  { %1913 = vmatpush3.bf16.msra.mxu1 %v1912_v4 }
 0x24d   :  { %1914 = vmatprep.subr.bf16.mxu1 %v2159_v10 }
 0x250   :  { %1916 = vmatpush3.bf16.msra.mxu1 %v1915_v6 }
 0x314   :  { %v1086_v7 = vpop.f32.mrb[8].mxu0 }
 0x315   :  { %v1087_v37 = vadd.f32 %v1086_v7, %v1019_v32  ;;  %v1665_v9 = vpop.f32.mrb[9].mxu0 }
 0x317   :  { %v1228_v13 = vmul.f32 -1.442695, %v1087_v37  ;;  %v1096_v18 = vmax.f32 %v1087_v37, 0.0 }
 0x319   :  { %2023 = vpow2.f32 %v1228_v13 }
 0x323   :  { %v2024_v14 = vpop.eup %2023 }
 0x324   :  { %v1093_v15 = vadd.f32 1.0, %v2024_v14 }
 0x326   :  { %2025 = vrcp.f32 %v1093_v15 }
 0x330   :  { %v2026_v17 = vpop.eup %2025 }
 0x331   :  { %v1098_v19 = vsub.f32 1.0, %v2026_v17  ;;  %v1097_v10 = vmul.f32 %v2026_v17, %v1096_v18 }
 0x333   :  { %v1099_v20 = vmul.f32 %v1098_v19, %v1015_v47 }
 0x335   :  { %v1100_v23 = vadd.f32 %v1099_v20, %v1097_v10 }
 0x337   :  { %1699 = vmatmul.mubr.f32.vlgmr.msra.gmra.mrb[8].mxu1 %v1100_v23 }
 0x40a   :  { %v1171_v26 = vpop.f32.mrb[8].mxu1 }
 0x40b   :  { %v1172_v28 = vadd.f32 %v1171_v26, %v1104_v25  ;;  %v1700_v8 = vpop.f32.mrb[9].mxu1 }
 0x40d   :  { %v1182_v31 = vsel %vm1181_vm11, %v1172_v28, -1e+30 }
 0x40e   :  { %1183 = vmax.xlane.f32.xlu1 %v1182_v31 }
 0x49b   :  { %v1184_v2 = vpop.xlane.xlu1 %1183 }
 0x49c   :  { %v1185_v33 = vsub.f32 %v1182_v31, %v1184_v2 }
 0x49e   :  { %v1186_v34 = vmul.f32 1.442695, %v1185_v33 }
 0x4a0   :  { %2027 = vpow2.f32 %v1186_v34 }
 0x4aa   :  { %v2028_v35 = vpop.eup %2027 }
 0x4ab   :  { %1188 = vadd.xlane.f32.xlu0 %v2028_v35 }
 0x538   :  { %v1189_v1 = vpop.xlane.xlu0 %1188 }
 0x539   :  { %2029 = vlog2.f32 %v1189_v1 }
 0x543   :  { %v2030_v36 = vpop.eup %2029 }
 0x544   :  { %v1191_v3 = vmul.f32 0.6931472, %v2030_v36 }
 0x546   :  { %v1192_v12 = vadd.f32 %v1191_v3, %v1184_v2 }
 0x548   :  { %v1193_v24 = vsub.f32 %v1182_v31, %v1192_v12 }
 0x54a   :  { %1194 = vst [vmem:[#allocation10] sm:$0xff] %v1193_v24 }
 0x54b   :  { %2130 = shalt.err (!%p2127_p8)
}
 0x54c   :  { %s2131_s1 = scalar_lea.hbm %s2635_s4, 128 }
 0x54d   :  { %p2132_p9 = scmp.ne.s32.totalorder %s2635_s4, %s2131_s1  ;;  %p2135_p10 = scmp.lt.u32.totalorder %s2131_s1, %s2635_s4 }
 0x54f   :  { %p2137_p11 = pnand %p2135_p10, %p2132_p9 }
 0x551   :  { %2140 = shalt.err (!%p2137_p11)
}
 0x552   :  { %1204 = dma.vmem_to_hbm [thread:$0]  %s1202_s25, 128, %s2635_s4, [#allocation4]  }
 0x553   :  { %2147 = dma.done.wait [#allocation4], 128  }
 0x554   :  { %2148 = vsyncadd [#allocation4], 4294967168 }
 0x555   :  { %1208 = vsyncpa [#allocation3], 1 }
 0x556   :  { %1209 = vsyncpa [#allocation6], 1 }
 0x557   :  { %1210 = vsyncpa [#allocation9], 1 }
 0x558   :  { %1211 = vsyncpa [#allocation4], 1 }

</bundles_post_ra>
